<compile_context>
chip_gen: v5e
topology: v5e:2x2
jax: 0.10.0
libtpu: 0.0.40
codegen_flags: <defaults>
</compile_context>

<pallas_src>
import functools

import jax
import jax.numpy as jnp
from jax import lax
from jax.experimental import pallas as pl
from jax.experimental.pallas import tpu as pltpu


def _round_up(v, m):
    return (v + m - 1) // m * m


def _vmem_capacity_bytes():
    try:
        info = pltpu.get_tpu_info()
        cap = getattr(info, "vmem_capacity_bytes", None)
        if cap:
            return int(cap)
    except Exception:
        pass
    return 64 * 1024 * 1024  # conservative fallback (v7x-sized part)


def _mbd_kernel(x_i_ref, x_j_ref, t_ref, g_ref, o_ref, m_i_ref, *,
                n_valid, n_pad, tile, okd, out_pad, mean):
    jb = pl.program_id(1)

    # ---- once per i-tile: projection M_i = x_i @ T and accumulator init ----------
    @pl.when(jb == 0)
    def _():
        m_i_ref[...] = jnp.dot(x_i_ref[...].astype(jnp.bfloat16), t_ref[...],
                               preferred_element_type=jnp.float32)
        o_ref[...] = jnp.zeros_like(o_ref)

    # ---- per j-block: projection M_j = x_j @ T ------------------------------------
    m_j = jnp.dot(x_j_ref[...].astype(jnp.bfloat16), t_ref[...],
                  preferred_element_type=jnp.float32)               # (tile, okd) f32

    if n_pad > n_valid:
        # Mask padded j rows cheaply on the (tile, okd) tensor: push them far away so
        # exp of the resulting (negated) norm underflows to exactly 0.
        jrow = jb * tile + lax.broadcasted_iota(jnp.int32, (tile, 1), 0)
        m_j = jnp.where(jrow < n_valid, m_j, jnp.float32(1e9))

    # ---- pairwise exp(-L1) statistics for this (i-tile, j-tile) pair --------------
    m_i = m_i_ref[...]                                              # (tile, okd) f32
    diff = jnp.abs(m_i[:, None, :] - m_j[None, :, :])               # (tile, tile, okd)
    diff2 = diff.reshape(tile * tile, okd).astype(jnp.bfloat16)
    # Group-sum over kernel_dims (and the exp(-.) negation, folded into G's -1
    # entries) as one big MXU matmul with f32 accumulation.
    norm_neg = jnp.dot(diff2, g_ref[...],
                       preferred_element_type=jnp.float32)          # (tile*tile, out_pad)
    e = jnp.exp(norm_neg).reshape(tile, tile, out_pad)
    o_ref[...] += e.sum(axis=1)                                     # (tile, out_pad)

    # ---- finalize at the last j-block ---------------------------------------------
    @pl.when(jb == pl.num_programs(1) - 1)
    def _():
        o = o_ref[...] - 1.0                   # remove the self term exp(0) == 1
        if mean:
            o = o * (1.0 / float(n_valid - 1))
        o_ref[...] = o


def minibatch_discrimination(x, T, *, mean=False, max_tile=None):
    """x: (N, in_features) float32; T: (in_features, out_features, kernel_dims)."""
    n, in_features = x.shape
    in_f_t, out_features, kernel_dims = T.shape
    assert in_f_t == in_features
    if mean:
        assert n > 1, "mean=True requires a minibatch of at least 2 rows"
    okd = out_features * kernel_dims
    out_pad = _round_up(out_features, 128)          # lane-dense output block

    # ---- generation-aware VMEM budgets --------------------------------------------
    vmem_cap = _vmem_capacity_bytes()
    if vmem_cap <= 64 * 1024 * 1024:                # v7x-class: 64 MiB per TensorCore
        slab_budget = 8 * 1024 * 1024
        vmem_cap_limit = 40 * 1024 * 1024
    else:                                           # v5e / v6e: 128 MiB
        slab_budget = 32 * 1024 * 1024
        vmem_cap_limit = 100 * 1024 * 1024

    # Per-step big temporaries scale as tile^2 * (6*okd + 8*out_pad) bytes.
    t_cap = int((slab_budget / float(6 * okd + 8 * out_pad)) ** 0.5)
    t_cap = (t_cap // 16 * 16) if t_cap >= 16 else 8   # keep tile^2 (MXU M-dim) aligned
    tile = min(_round_up(max(n, 8), 8), t_cap)
    if max_tile is not None:                        # test hook: force a multi-tile grid
        tile = min(tile, max(8, (max_tile // 8) * 8))
    n_pad = _round_up(n, tile)
    grid_n = n_pad // tile

    # ---- operands ------------------------------------------------------------------
    x_f32 = x.astype(jnp.float32)
    x_pad = x_f32 if n_pad == n else jnp.pad(x_f32, ((0, n_pad - n), (0, 0)))
    t_flat = T.reshape(in_features, okd).astype(jnp.bfloat16)
    # Block-diagonal group-sum matrix with exp(-.)'s negation folded in:
    # G[b*kd + k, b] = -1, zero-padded to a lane-dense out_pad, exact in bf16.
    g = jnp.kron(jnp.eye(out_features, dtype=jnp.float32),
                 jnp.ones((kernel_dims, 1), dtype=jnp.float32))
    g = (-jnp.pad(g, ((0, 0), (0, out_pad - out_features)))).astype(jnp.bfloat16)

    kernel = functools.partial(
        _mbd_kernel, n_valid=n, n_pad=n_pad, tile=tile, okd=okd,
        out_pad=out_pad, mean=mean)

    # Resident-buffer estimate (+40% headroom), clamped to a per-generation cap.
    est_bytes = (
        4 * tile * in_features * 4          # x_i + x_j blocks (f32, double-buffered)
        + 2 * in_features * okd * 2         # T (bf16, double-buffered)
        + 2 * okd * out_pad * 2             # G (bf16, double-buffered)
        + 2 * tile * out_pad * 4            # output block (f32)
        + 2 * tile * okd * 4                # M_i scratch + M_j temporary (f32)
        + tile * tile * okd * (4 + 2)       # |diff| slab (f32) + bf16 copy
        + 2 * tile * tile * out_pad * 4     # norm / exp slabs (f32)
    )
    vmem_limit = int(min(max(int(est_bytes * 1.4), 32 * 1024 * 1024), vmem_cap_limit))

    o_b = pl.pallas_call(
        kernel,
        out_shape=jax.ShapeDtypeStruct((n_pad, out_pad), jnp.float32),
        grid_spec=pltpu.PrefetchScalarGridSpec(
            num_scalar_prefetch=0,
            grid=(grid_n, grid_n),
            in_specs=[
                pl.BlockSpec((tile, in_features), lambda i, j: (i, 0)),  # x rows (i)
                pl.BlockSpec((tile, in_features), lambda i, j: (j, 0)),  # x rows (j)
                pl.BlockSpec((in_features, okd), lambda i, j: (0, 0)),   # T (flattened)
                pl.BlockSpec((okd, out_pad), lambda i, j: (0, 0)),       # G group-sum
            ],
            out_specs=pl.BlockSpec((tile, out_pad), lambda i, j: (i, 0)),
            scratch_shapes=[pltpu.VMEM((tile, okd), jnp.float32)],       # M_i
        ),
        compiler_params=pltpu.CompilerParams(
            dimension_semantics=("parallel", "arbitrary"),
            vmem_limit_bytes=vmem_limit),
    )(x_pad, x_pad, t_flat, g)

    # torch.cat([x, o_b], dim=1): layout-only op left to XLA; x never streams through
    # the kernel.  Keep this slice — padded rows/lanes of the kernel output carry
    # bookkeeping values, not zeros.
    return jnp.concatenate([x_f32, o_b[:n, :out_features]], axis=1)


def _reference(x, T, mean=False):
    n, in_f = x.shape
    _, out_f, kd = T.shape
    m = (x @ T.reshape(in_f, out_f * kd)).reshape(n, out_f, kd)
    norm = jnp.abs(m[None, :, :, :] - m[:, None, :, :]).sum(-1)     # (N, N, out)
    o_b = jnp.exp(-norm).sum(0) - 1.0
    if mean:
        o_b = o_b / (n - 1)
    return jnp.concatenate([x, o_b], axis=1)


if __name__ == "__main__":
    # Small, deterministic shapes consistent with the module's forward.
    N, IN_FEATURES, OUT_FEATURES, KERNEL_DIMS = 8, 32, 16, 64

    key = jax.random.PRNGKey(0)
    kx, kt, kx2 = jax.random.split(key, 3)
    x = jax.random.normal(kx, (N, IN_FEATURES), dtype=jnp.float32)
    # nn.init.normal_(self.T, 0, 1) -> standard normal, deterministic here.
    T = jax.random.normal(kt, (IN_FEATURES, OUT_FEATURES, KERNEL_DIMS),
                          dtype=jnp.float32)

    out = jax.block_until_ready(minibatch_discrimination(x, T, mean=False))
    ref = _reference(x, T, mean=False)
    assert out.shape == (N, IN_FEATURES + OUT_FEATURES)
    assert jnp.allclose(out, ref, atol=1e-4, rtol=1e-4), "mismatch vs reference (mean=False)"

    out_m = jax.block_until_ready(minibatch_discrimination(x, T, mean=True))
    ref_m = _reference(x, T, mean=True)
    assert jnp.allclose(out_m, ref_m, atol=1e-4, rtol=1e-4), "mismatch vs reference (mean=True)"

    # Exercise the multi-tile grid (parallel i-tiles, accumulated j-blocks) and the
    # padded-j-row masking path with a batch that is not a multiple of the tile.
    N2 = 20
    x2 = jax.random.normal(kx2, (N2, IN_FEATURES), dtype=jnp.float32)
    out2 = jax.block_until_ready(
        minibatch_discrimination(x2, T, mean=False, max_tile=8))
    ref2 = _reference(x2, T, mean=False)
    assert out2.shape == (N2, IN_FEATURES + OUT_FEATURES)
    assert jnp.allclose(out2, ref2, atol=1e-4, rtol=1e-4), "mismatch vs reference (tiled)"

    print("KERNEL_OK")
</pallas_src>

<mosaic_0001>
module attributes {stable_mosaic.version = 11 : i64} {
  func.func @_mbd_kernel(%arg0: i32, %arg1: i32, %arg2: memref<8x32xf32, #tpu.memory_space<vmem>>, %arg3: memref<8x32xf32, #tpu.memory_space<vmem>>, %arg4: memref<32x1024xbf16, #tpu.memory_space<vmem>>, %arg5: memref<1024x128xbf16, #tpu.memory_space<vmem>>, %arg6: memref<8x128xf32, #tpu.memory_space<vmem>>, %arg7: memref<8x1024xf32, #tpu.memory_space<vmem>>) attributes {dimension_semantics = [#tpu.dimension_semantics<parallel>, #tpu.dimension_semantics<arbitrary>], iteration_bounds = array<i64: 1, 1>, scalar_prefetch = 0 : i64, scratch_operands = 1 : i64, tpu.core_type = #tpu.core_type<tc>, window_params = [{transform_indices = @transform_0, window_bounds = array<i64: 8, 32>}, {transform_indices = @transform_1, window_bounds = array<i64: 8, 32>}, {pipeline_mode = #tpu.pipeline_mode<synchronous>, transform_indices = @transform_2, window_bounds = array<i64: 32, 1024>}, {pipeline_mode = #tpu.pipeline_mode<synchronous>, transform_indices = @transform_3, window_bounds = array<i64: 1024, 128>}, {transform_indices = @transform_4, window_bounds = array<i64: 8, 128>}]} {
    %c0_i32 = arith.constant 0 : i32
    %0 = arith.cmpi eq, %arg1, %c0_i32 : i32
    %1 = arith.extui %0 : i1 to i32
    %c0_i32_0 = arith.constant 0 : i32
    %2 = arith.cmpi ne, %1, %c0_i32_0 : i32
    scf.if %2 {
      %c0_16 = arith.constant 0 : index
      %c0_17 = arith.constant 0 : index
      %27 = vector.load %arg2[%c0_16, %c0_17] : memref<8x32xf32, #tpu.memory_space<vmem>>, vector<8x32xf32>
      %28 = arith.truncf %27 : vector<8x32xf32> to vector<8x32xbf16>
      %c0_18 = arith.constant 0 : index
      %c0_19 = arith.constant 0 : index
      %29 = vector.load %arg4[%c0_18, %c0_19] : memref<32x1024xbf16, #tpu.memory_space<vmem>>, vector<32x1024xbf16>
      %cst_20 = arith.constant dense<0.000000e+00> : vector<8x1024xf32>
      %30 = tpu.matmul %28, %29, %cst_20 {dimension_numbers = #tpu.dot_dimension_numbers<[1], [0], [0], [1], [0, 0, 1, 1], [], []>} : vector<8x32xbf16>, vector<32x1024xbf16>, vector<8x1024xf32> -> vector<8x1024xf32>
      %c0_21 = arith.constant 0 : index
      %c0_22 = arith.constant 0 : index
      %31 = vector.load %arg7[%c0_21, %c0_22] : memref<8x1024xf32, #tpu.memory_space<vmem>>, vector<8x1024xf32>
      tpu.vector_store %arg7[%c0_21, %c0_22], %30 {strides = array<i32>} : memref<8x1024xf32, #tpu.memory_space<vmem>>, vector<8x1024xf32>,
      %cst_23 = arith.constant 0.000000e+00 : f32
      %32 = vector.broadcast %cst_23 : f32 to vector<8x128xf32>
      %c0_24 = arith.constant 0 : index
      %c0_25 = arith.constant 0 : index
      %33 = vector.load %arg6[%c0_24, %c0_25] : memref<8x128xf32, #tpu.memory_space<vmem>>, vector<8x128xf32>
      tpu.vector_store %arg6[%c0_24, %c0_25], %32 {strides = array<i32>} : memref<8x128xf32, #tpu.memory_space<vmem>>, vector<8x128xf32>,
    } else {
    }
    %c0 = arith.constant 0 : index
    %c0_1 = arith.constant 0 : index
    %3 = vector.load %arg3[%c0, %c0_1] : memref<8x32xf32, #tpu.memory_space<vmem>>, vector<8x32xf32>
    %4 = arith.truncf %3 : vector<8x32xf32> to vector<8x32xbf16>
    %c0_2 = arith.constant 0 : index
    %c0_3 = arith.constant 0 : index
    %5 = vector.load %arg4[%c0_2, %c0_3] : memref<32x1024xbf16, #tpu.memory_space<vmem>>, vector<32x1024xbf16>
    %cst = arith.constant dense<0.000000e+00> : vector<8x1024xf32>
    %6 = tpu.matmul %4, %5, %cst {dimension_numbers = #tpu.dot_dimension_numbers<[1], [0], [0], [1], [0, 0, 1, 1], [], []>} : vector<8x32xbf16>, vector<32x1024xbf16>, vector<8x1024xf32> -> vector<8x1024xf32>
    %c0_4 = arith.constant 0 : index
    %c0_5 = arith.constant 0 : index
    %7 = vector.load %arg7[%c0_4, %c0_5] : memref<8x1024xf32, #tpu.memory_space<vmem>>, vector<8x1024xf32>
    %8 = vector.shape_cast %7 : vector<8x1024xf32> to vector<8x1x1024xf32>
    %9 = vector.shape_cast %6 : vector<8x1024xf32> to vector<1x8x1024xf32>
    %10 = vector.broadcast %8 : vector<8x1x1024xf32> to vector<8x8x1024xf32>
    %11 = vector.broadcast %9 : vector<1x8x1024xf32> to vector<8x8x1024xf32>
    %12 = arith.subf %10, %11 : vector<8x8x1024xf32>
    %13 = math.absf %12 : vector<8x8x1024xf32>
    %14 = vector.shape_cast %13 : vector<8x8x1024xf32> to vector<64x1024xf32>
    %15 = arith.truncf %14 : vector<64x1024xf32> to vector<64x1024xbf16>
    %c0_6 = arith.constant 0 : index
    %c0_7 = arith.constant 0 : index
    %16 = vector.load %arg5[%c0_6, %c0_7] : memref<1024x128xbf16, #tpu.memory_space<vmem>>, vector<1024x128xbf16>
    %cst_8 = arith.constant dense<0.000000e+00> : vector<64x128xf32>
    %17 = tpu.matmul %15, %16, %cst_8 {dimension_numbers = #tpu.dot_dimension_numbers<[1], [0], [0], [1], [0, 0, 1, 1], [], []>} : vector<64x1024xbf16>, vector<1024x128xbf16>, vector<64x128xf32> -> vector<64x128xf32>
    %18 = math.exp %17 : vector<64x128xf32>
    %19 = vector.shape_cast %18 : vector<64x128xf32> to vector<8x8x128xf32>
    %c0_9 = arith.constant 0 : index
    %c0_10 = arith.constant 0 : index
    %20 = vector.load %arg6[%c0_9, %c0_10] : memref<8x128xf32, #tpu.memory_space<vmem>>, vector<8x128xf32>
    %cst_11 = arith.constant dense<0.000000e+00> : vector<8x128xf32>
    %21 = vector.multi_reduction <add>, %19, %cst_11 [1] : vector<8x8x128xf32> to vector<8x128xf32>
    %22 = arith.addf %20, %21 : vector<8x128xf32>
    %c0_12 = arith.constant 0 : index
    %c0_13 = arith.constant 0 : index
    %23 = vector.load %arg6[%c0_12, %c0_13] : memref<8x128xf32, #tpu.memory_space<vmem>>, vector<8x128xf32>
    tpu.vector_store %arg6[%c0_12, %c0_13], %22 {strides = array<i32>} : memref<8x128xf32, #tpu.memory_space<vmem>>, vector<8x128xf32>,
    %c0_i32_14 = arith.constant 0 : i32
    %24 = arith.cmpi eq, %arg1, %c0_i32_14 : i32
    %25 = arith.extui %24 : i1 to i32
    %c0_i32_15 = arith.constant 0 : i32
    %26 = arith.cmpi ne, %25, %c0_i32_15 : i32
    scf.if %26 {
      %c0_16 = arith.constant 0 : index
      %c0_17 = arith.constant 0 : index
      %27 = vector.load %arg6[%c0_16, %c0_17] : memref<8x128xf32, #tpu.memory_space<vmem>>, vector<8x128xf32>
      %cst_18 = arith.constant 1.000000e+00 : f32
      %28 = vector.broadcast %cst_18 : f32 to vector<8x128xf32>
      %29 = arith.subf %27, %28 : vector<8x128xf32>
      %c0_19 = arith.constant 0 : index
      %c0_20 = arith.constant 0 : index
      %30 = vector.load %arg6[%c0_19, %c0_20] : memref<8x128xf32, #tpu.memory_space<vmem>>, vector<8x128xf32>
      tpu.vector_store %arg6[%c0_19, %c0_20], %29 {strides = array<i32>} : memref<8x128xf32, #tpu.memory_space<vmem>>, vector<8x128xf32>,
    } else {
    }
    return
  }
  func.func @transform_0(%arg0: i32, %arg1: i32) -> (i32, i32) {
    %c0_i32 = arith.constant 0 : i32
    %c0_i32_0 = arith.constant 0 : i32
    return %arg0, %c0_i32 : i32, i32
  }
  func.func @transform_1(%arg0: i32, %arg1: i32) -> (i32, i32) {
    %c0_i32 = arith.constant 0 : i32
    %c0_i32_0 = arith.constant 0 : i32
    return %arg1, %c0_i32 : i32, i32
  }
  func.func @transform_2(%arg0: i32, %arg1: i32) -> (i32, i32) {
    %c0_i32 = arith.constant 0 : i32
    %c0_i32_0 = arith.constant 0 : i32
    %c0_i32_1 = arith.constant 0 : i32
    return %c0_i32, %c0_i32_0 : i32, i32
  }
  func.func @transform_3(%arg0: i32, %arg1: i32) -> (i32, i32) {
    %c0_i32 = arith.constant 0 : i32
    %c0_i32_0 = arith.constant 0 : i32
    %c0_i32_1 = arith.constant 0 : i32
    return %c0_i32, %c0_i32_0 : i32, i32
  }
  func.func @transform_4(%arg0: i32, %arg1: i32) -> (i32, i32) {
    %c0_i32 = arith.constant 0 : i32
    %c0_i32_0 = arith.constant 0 : i32
    return %arg0, %c0_i32 : i32, i32
  }
}

</mosaic_0001>

<bundles_post_ra>
// kernel: tpu_custom_call.1
= control target key start
LH: loop header
LB: loop body
LE: loop exit
PB: predicated region body
PF: predicated region fallthrough
CT: control target
= control target key end

     0   :  { %9 = vsyncpa [#allocation4], 0  ;;  %s2807_s0 = inlined_call_operand.hbm [shape: f32[8,32], index: 0, kind: input, shape index: {}]   ;;  %s2808_s1 = inlined_call_operand.hbm [shape: f32[8,32], index: 1, kind: input, shape index: {}]   ;;  %s2809_s2 = inlined_call_operand.hbm [shape: bf16[32,1024], index: 2, kind: input, shape index: {}]   ;;  %s2810_s3 = inlined_call_operand.hbm [shape: bf16[1024,128], index: 3, kind: input, shape index: {}]   ;;  %s2811_s4 = inlined_call_operand.hbm [shape: f32[8,128], index: 4, kind: output, shape index: {}]  }
   0x1   :  { %10 = vsyncpa [#allocation7], 0 }
   0x2   :  { %11 = vsyncpa [#allocation10], 0  ;;  %s29_s17 = sshll.u32 %s2808_s1, 4  ;;  %s30_s17 = int_to_ptr.hbm [resolvable:$true] %s29_s17 }
   0x3   :  { %12 = vsyncpa [#allocation5], 0  ;;  %s2401_s18 = smov [#allocation6]   ;;  %s18_s22 = sshll.u32 %s2807_s0, 4  ;;  %s19_s22 = int_to_ptr.hbm [resolvable:$true] %s18_s22 }
   0x4   :  { %s31_s19 = sshll.u32 %s2401_s18, 4  ;;  %s2402_s23 = smov [#allocation3]   ;;  %s32_s19 = int_to_ptr.vmem [resolvable:$true] %s31_s19 }
   0x5   :  { %34 = dma.hbm_to_vmem [thread:$0]  %s30_s17, 128, %s32_s19, [#allocation7]  }
   0x6   :  { %s20_s24 = sshll.u32 %s2402_s23, 4  ;;  %s39_s27 = sshll.u32 %s2809_s2, 4  ;;  %s21_s24 = int_to_ptr.vmem [resolvable:$true] %s20_s24  ;;  %s40_s27 = int_to_ptr.hbm [resolvable:$true] %s39_s27 }
   0x7   :  { %23 = dma.hbm_to_vmem [thread:$0]  %s19_s22, 128, %s21_s24, [#allocation4]  }
   0x8   :  { %s2403_s1 = smov [#allocation8]   ;;  %s52_s5 = sshll.u32 %s2810_s3, 4  ;;  %s53_s5 = int_to_ptr.hbm [resolvable:$true] %s52_s5 }
   0x9   :  { %s41_s28 = sshll.u32 %s2403_s1, 4  ;;  %s2404_s6 = smov 512   ;;  %s42_s28 = int_to_ptr.vmem [resolvable:$true] %s41_s28 }
   0xa   :  { %s2405_s0 = smov 32   ;;  %s2406_s7 = smov [#allocation9]  }
   0xb   :  { %47 = dma.hbm_to_vmem [thread:$0]  %s40_s27, 2048, %s42_s28, [#allocation7], %s2404_s6, %s2404_s6, %s2405_s0  }
   0xc   :  { %s54_s8 = sshll.u32 %s2406_s7, 4  ;;  %s2407_s9 = smov 64   ;;  %s55_s8 = int_to_ptr.vmem [resolvable:$true] %s54_s8 }
   0xd   :  { %s2408_s10 = smov 4  }
   0xe   :  { %60 = dma.hbm_to_vmem [thread:$0]  %s53_s5, 8192, %s55_s8, [#allocation10], %s2407_s9, %s2407_s9, %s2408_s10  }
   0xf   :  { %2393 = dma.done.wait [#allocation4], 128  }
  0x10   :  { %2394 = vsyncadd [#allocation4], 4294967168 }
  0x11   :  { %2395 = dma.done.wait [#allocation7], 2176  }
  0x12   :  { %2396 = vsyncadd [#allocation7], 4294965120 }
  0x13   :  { %2397 = dma.done.wait [#allocation10], 8192  }
  0x14   :  { %2398 = vsyncadd [#allocation10], 4294959104  ;;  %v1784_v0 = vld [vmem:[#allocation8 + $0x40] sm:$0xf]  ;;  %v2159_v2 = vld [vmem:[#allocation8 + $0x44] sm:$0xf] }
  0x15   :  { %v2163_v1 = vld [vmem:[#allocation8 + $0x5c] sm:$0xf0]  ;;  %v1786_v4 = vld [vmem:[#allocation8 + $0x60] sm:$0xf0]  ;;  %v1792_v5 = vld [vmem:[#allocation8 + $0x48] sm:$0xf] }
  0x16   :  { %v1785_v3 = vor.u32 %v2163_v1, %v1784_v0  ;;  %v2164_v6 = vld [vmem:[#allocation8 + $0x64] sm:$0xf0]  ;;  %v1789_v7 = vor.u32 %v2159_v2, %v1786_v4  ;;  %v2160_v9 = vld [vmem:[#allocation8 + $0x4c] sm:$0xf]  ;;  %v1752_v11 = vld [vmem:[#allocation8] sm:$0xf] }
  0x17   :  { %v1793_v8 = vor.u32 %v2164_v6, %v1792_v5  ;;  %v1794_v10 = vld [vmem:[#allocation8 + $0x68] sm:$0xf0]  ;;  %v2155_v13 = vld [vmem:[#allocation8 + $0x1c] sm:$0xf0]  ;;  %v2151_v14 = vld [vmem:[#allocation8 + $0x4] sm:$0xf] }
  0x18   :  { %190 = vmatpush.bf16.msra.mxu0 %v1785_v3  ;;  %v1797_v12 = vor.u32 %v2160_v9, %v1794_v10  ;;  %v1754_v15 = vld [vmem:[#allocation8 + $0x20] sm:$0xf0]  ;;  %203 = vmatpush.bf16.msra.mxu1 %v1789_v7  ;;  %v1753_v16 = vor.u32 %v2155_v13, %v1752_v11  ;;  %v1760_v18 = vld [vmem:[#allocation8 + $0x8] sm:$0xf]  ;;  %v2152_v20 = vld [vmem:[#allocation8 + $0xc] sm:$0xf] }
  0x19   :  { %216 = vmatpush.bf16.msra.mxu2 %v1793_v8  ;;  %v1757_v17 = vor.u32 %v2151_v14, %v1754_v15  ;;  %v2156_v19 = vld [vmem:[#allocation8 + $0x24] sm:$0xf0]  ;;  %v1762_v22 = vld [vmem:[#allocation8 + $0x28] sm:$0xf0]  ;;  %v82_v23 = vld [vmem:[#allocation3] sm:$0xff]  ;;  %vm180_vm0 = vcmask 261120  }
  0x1a   :  { %229 = vmatpush.bf16.msra.mxu3 %v1797_v12  ;;  %v1761_v21 = vor.u32 %v2156_v19, %v1760_v18  ;;  %v1808_v24 = vld [vmem:[#allocation8 + $0x58] sm:$0xf]  ;;  %v1765_v25 = vor.u32 %v2152_v20, %v1762_v22  ;;  %v2447_v26 = vpack.c.bf16 %v82_v23, %v82_v23  ;;  %v2162_v28 = vld [vmem:[#allocation8 + $0x5c] sm:$0xf]  ;;  %v1800_v32 = vld [vmem:[#allocation8 + $0x50] sm:$0xf] }
  0x1b   :  { %v2166_v27 = vld [vmem:[#allocation8 + $0x74] sm:$0xf0]  ;;  %v1810_v29 = vld [vmem:[#allocation8 + $0x78] sm:$0xf0]  ;;  %v2165_v33 = vld [vmem:[#allocation8 + $0x6c] sm:$0xf0] }
  0x1c   :  { %191 = vmatpush.bf16.msra.mxu0 %v1753_v16  ;;  %v1809_v30 = vor.u32 %v2166_v27, %v1808_v24  ;;  %v1813_v31 = vor.u32 %v2162_v28, %v1810_v29  ;;  %v1776_v34 = vld [vmem:[#allocation8 + $0x18] sm:$0xf]  ;;  %204 = vmatpush.bf16.msra.mxu1 %v1757_v17  ;;  %v1801_v35 = vor.u32 %v2165_v33, %v1800_v32  ;;  %v2161_v37 = vld [vmem:[#allocation8 + $0x54] sm:$0xf]  ;;  %v2154_v41 = vld [vmem:[#allocation8 + $0x1c] sm:$0xf] }
  0x1d   :  { %217 = vmatpush.bf16.msra.mxu2 %v1761_v21  ;;  %v2158_v36 = vld [vmem:[#allocation8 + $0x34] sm:$0xf0]  ;;  %v1802_v38 = vld [vmem:[#allocation8 + $0x70] sm:$0xf0]  ;;  %v1778_v42 = vld [vmem:[#allocation8 + $0x38] sm:$0xf0] }
  0x1e   :  { %230 = vmatpush.bf16.msra.mxu3 %v1765_v25  ;;  %v1777_v39 = vor.u32 %v2158_v36, %v1776_v34  ;;  %v1805_v40 = vor.u32 %v2161_v37, %v1802_v38  ;;  %v1768_v43 = vld [vmem:[#allocation8 + $0x10] sm:$0xf]  ;;  %v1781_v44 = vor.u32 %v2154_v41, %v1778_v42  ;;  %v2153_v46 = vld [vmem:[#allocation8 + $0x14] sm:$0xf]  ;;  %v1864_v48 = vld [vmem:[#allocation8 + $0x48] sm:$0xf] }
  0x1f   :  { %1814 = vmatmul.msk.bf16.vlgmr.msra.gmra.mxu0 %vm180_vm0, %v2447_v26  ;;  %v2157_v45 = vld [vmem:[#allocation8 + $0x2c] sm:$0xf0]  ;;  %v1770_v47 = vld [vmem:[#allocation8 + $0x30] sm:$0xf0]  ;;  %1815 = vmatmul.msk.bf16.vlgmr.msra.gmra.mxu1 %vm180_vm0, %v2447_v26  ;;  %v2180_v49 = vld [vmem:[#allocation8 + $0x64] sm:$0xf0] }
  0x20   :  { %1816 = vmatmul.msk.bf16.vlgmr.msra.gmra.mxu2 %vm180_vm0, %v2447_v26  ;;  %v2176_v50 = vld [vmem:[#allocation8 + $0x4c] sm:$0xf]  ;;  %242 = vmatpush.bf16.msrb.mxu0 %v1801_v35  ;;  %v1769_v51 = vor.u32 %v2157_v45, %v1768_v43  ;;  %v1865_v52 = vor.u32 %v2180_v49, %v1864_v48  ;;  %v1856_v54 = vld [vmem:[#allocation8 + $0x40] sm:$0xf]  ;;  %v1773_v56 = vor.u32 %v2153_v46, %v1770_v47  ;;  %v1832_v59 = vld [vmem:[#allocation8 + $0x8] sm:$0xf] }
  0x21   :  { %268 = vmatpush.bf16.msrb.mxu2 %v1809_v30  ;;  %1817 = vmatmul.msk.bf16.vlgmr.msra.gmra.mxu3 %vm180_vm0, %v2447_v26  ;;  %v1866_v53 = vld [vmem:[#allocation8 + $0x68] sm:$0xf0]  ;;  %v2179_v55 = vld [vmem:[#allocation8 + $0x5c] sm:$0xf0]  ;;  %v2172_v60 = vld [vmem:[#allocation8 + $0x24] sm:$0xf0] }
  0x22   :  { %281 = vmatpush.bf16.msrb.mxu3 %v1813_v31  ;;  %255 = vmatpush.bf16.msrb.mxu1 %v1805_v40  ;;  %v1869_v57 = vor.u32 %v2176_v50, %v1866_v53  ;;  %v1857_v58 = vor.u32 %v2179_v55, %v1856_v54  ;;  %v2175_v61 = vld [vmem:[#allocation8 + $0x44] sm:$0xf]  ;;  %v1833_v62 = vor.u32 %v2172_v60, %v1832_v59  ;;  %v2168_v0 = vld [vmem:[#allocation8 + $0xc] sm:$0xf]  ;;  %v1824_v4 = vld [vmem:[#allocation8] sm:$0xf] }
  0x23   :  { %v1858_v63 = vld [vmem:[#allocation8 + $0x60] sm:$0xf0]  ;;  %v1834_v1 = vld [vmem:[#allocation8 + $0x28] sm:$0xf0]  ;;  %v2171_v5 = vld [vmem:[#allocation8 + $0x1c] sm:$0xf0] }
  0x24   :  { %v1861_v2 = vor.u32 %v2175_v61, %v1858_v63  ;;  %v1837_v3 = vor.u32 %v2168_v0, %v1834_v1  ;;  %v2167_v6 = vld [vmem:[#allocation8 + $0x4] sm:$0xf]  ;;  %243 = vmatpush.bf16.msrb.mxu0 %v1769_v51  ;;  %v1825_v8 = vor.u32 %v2171_v5, %v1824_v4  ;;  %v1872_v10 = vld [vmem:[#allocation8 + $0x50] sm:$0xf]  ;;  %v2177_v12 = vld [vmem:[#allocation8 + $0x54] sm:$0xf] }
  0x25   :  { %269 = vmatpush.bf16.msrb.mxu2 %v1777_v39  ;;  %v1826_v7 = vld [vmem:[#allocation8 + $0x20] sm:$0xf0]  ;;  %v2181_v11 = vld [vmem:[#allocation8 + $0x6c] sm:$0xf0]  ;;  %v1874_v13 = vld [vmem:[#allocation8 + $0x70] sm:$0xf0] }
  0x26   :  { %282 = vmatpush.bf16.msrb.mxu3 %v1781_v44  ;;  %256 = vmatpush.bf16.msrb.mxu1 %v1773_v56  ;;  %v1829_v9 = vor.u32 %v2167_v6, %v1826_v7  ;;  %v1880_v14 = vld [vmem:[#allocation8 + $0x58] sm:$0xf]  ;;  %v2178_v16 = vld [vmem:[#allocation8 + $0x5c] sm:$0xf]  ;;  %v1873_v18 = vor.u32 %v2181_v11, %v1872_v10  ;;  %v1877_v19 = vor.u32 %v2177_v12, %v1874_v13  ;;  %v1840_v21 = vld [vmem:[#allocation8 + $0x10] sm:$0xf] }
  0x27   :  { %v2182_v15 = vld [vmem:[#allocation8 + $0x74] sm:$0xf0]  ;;  %v1882_v17 = vld [vmem:[#allocation8 + $0x78] sm:$0xf0]  ;;  %v2173_v22 = vld [vmem:[#allocation8 + $0x2c] sm:$0xf0] }
  0x28   :  { %405 = vmatpush.bf16.msra.mxu0 %v1857_v58  ;;  %v1881_v20 = vor.u32 %v2182_v15, %v1880_v14  ;;  %v2169_v23 = vld [vmem:[#allocation8 + $0x14] sm:$0xf]  ;;  %v1885_v24 = vor.u32 %v2178_v16, %v1882_v17  ;;  %v1848_v27 = vld [vmem:[#allocation8 + $0x18] sm:$0xf]  ;;  %v2170_v29 = vld [vmem:[#allocation8 + $0x1c] sm:$0xf]  ;;  %v1841_v31 = vor.u32 %v2173_v22, %v1840_v21 }
  0x29   :  { %431 = vmatpush.bf16.msra.mxu2 %v1865_v52  ;;  %v1842_v25 = vld [vmem:[#allocation8 + $0x30] sm:$0xf0]  ;;  %v2174_v28 = vld [vmem:[#allocation8 + $0x34] sm:$0xf0]  ;;  %v1850_v30 = vld [vmem:[#allocation8 + $0x38] sm:$0xf0] }
  0x2a   :  { %444 = vmatpush.bf16.msra.mxu3 %v1869_v57  ;;  %418 = vmatpush.bf16.msra.mxu1 %v1861_v2  ;;  %v1845_v32 = vor.u32 %v2169_v23, %v1842_v25  ;;  %v1849_v33 = vor.u32 %v2174_v28, %v1848_v27  ;;  %v1853_v34 = vor.u32 %v2170_v29, %v1850_v30  ;;  %v297_v35 = vld [vmem:[#allocation6] sm:$0xff]  ;;  %v2189_v38 = vld [vmem:[#allocation9 + $0x30] sm:$0xff]  ;;  %v2188_v42 = vld [vmem:[#allocation9 + $0x28] sm:$0xff]  ;;  %vm528_vm1 = vcmask 1042434   ;;  %s2409_s2 = smov [#allocation11]   ;;  %s1738_s13 = sshll.u32 %s2811_s4, 4  ;;  %s1739_s13 = int_to_ptr.hbm [resolvable:$true] %s1738_s13 }
  0x2b   :  { %v298_v36 = vpack.c.bf16 %v297_v35, %v297_v35  ;;  %v2198_v37 = vld [vmem:[#allocation9 + $0x78] sm:$0xff]  ;;  %v2197_v39 = vld [vmem:[#allocation9 + $0x70] sm:$0xff]  ;;  %v2196_v43 = vld [vmem:[#allocation9 + $0x68] sm:$0xff]  ;;  %vm532_vm2 = vcmask 1044484   ;;  %vm534_vm3 = vcmask 1046534   ;;  %vm540_vm4 = vcmask 1041409  }
  0x2c   :  { %406 = vmatpush.bf16.msra.mxu0 %v1825_v8  ;;  %v2206_v40 = vld [vmem:[#allocation9 + $0xb8] sm:$0xff]  ;;  %v2205_v44 = vld [vmem:[#allocation9 + $0xb0] sm:$0xff]  ;;  %v2187_v46 = vld [vmem:[#allocation9 + $0x20] sm:$0xff]  ;;  %vm542_vm5 = vcmask 1043459   ;;  %vm546_vm6 = vcmask 1045509   ;;  %vm548_vm7 = vcmask 1046528  }
  0x2d   :  { %432 = vmatpush.bf16.msra.mxu2 %v1833_v62  ;;  %v2214_v41 = vld [vmem:[#allocation9 + $0xf8] sm:$0xff]  ;;  %v2213_v45 = vld [vmem:[#allocation9 + $0xf0] sm:$0xff]  ;;  %v2195_v47 = vld [vmem:[#allocation9 + $0x60] sm:$0xff]  ;;  %vm526_vm8 = vcmask 1040384   ;;  %vm544_vm9 = vcmask 1042433   ;;  %vm2813_vm11 = vcmask 1043458  }
  0x2e   :  { %445 = vmatpush.bf16.msra.mxu3 %v1837_v3  ;;  %419 = vmatpush.bf16.msra.mxu1 %v1829_v9  ;;  %v2204_v48 = vld [vmem:[#allocation9 + $0xa8] sm:$0xff]  ;;  %v2186_v50 = vld [vmem:[#allocation9 + $0x18] sm:$0xff]  ;;  %v2203_v52 = vld [vmem:[#allocation9 + $0xa0] sm:$0xff]  ;;  %vm561_vm12 = vcmask 1045504   ;;  %vm2812_vm13 = vcmask 1044483   ;;  %vm574_vm10 = vcmask 1046531  }
  0x2f   :  { %1818 = vmatmul.msk.bf16.vlgmr.msrb.gmra.mxu0 %vm180_vm0, %v2447_v26  ;;  %1819 = vmatmul.msk.bf16.vlgmr.msrb.gmra.mxu1 %vm180_vm0, %v2447_v26  ;;  %v2212_v49 = vld [vmem:[#allocation9 + $0xe8] sm:$0xff]  ;;  %v2194_v51 = vld [vmem:[#allocation9 + $0x58] sm:$0xff]  ;;  %v2211_v53 = vld [vmem:[#allocation9 + $0xe0] sm:$0xff]  ;;  %vm530_vm15 = vcmask 1041408   ;;  %vm2814_vm14 = vcmask 1046533   ;;  %s1736_s3 = sshll.u32 %s2409_s2, 4  ;;  %s1737_s3 = int_to_ptr.vmem [resolvable:$true] %s1736_s3 }
  0x30   :  { %1820 = vmatmul.msk.bf16.vlgmr.msrb.gmra.mxu2 %vm180_vm0, %v2447_v26  ;;  %457 = vmatpush.bf16.msrb.mxu0 %v1873_v18  ;;  %v2185_v55 = vld [vmem:[#allocation9 + $0x10] sm:$0xff]  ;;  %v2202_v58 = vld [vmem:[#allocation9 + $0x98] sm:$0xff]  ;;  %v2184_v60 = vld [vmem:[#allocation9 + $0x8] sm:$0xff] }
  0x31   :  { %1821 = vmatmul.msk.bf16.vlgmr.msrb.gmra.mxu3 %vm180_vm0, %v2447_v26  ;;  %483 = vmatpush.bf16.msrb.mxu2 %v1881_v20  ;;  %v2190_v26 = vld [vmem:[#allocation9 + $0x38] sm:$0xff]  ;;  %v2193_v56 = vld [vmem:[#allocation9 + $0x50] sm:$0xff]  ;;  %v2192_v61 = vld [vmem:[#allocation9 + $0x48] sm:$0xff] }
  0x32   :  { %470 = vmatpush.bf16.msrb.mxu1 %v1877_v19  ;;  %496 = vmatpush.bf16.msrb.mxu3 %v1885_v24  ;;  %v2210_v59 = vld [vmem:[#allocation9 + $0xd8] sm:$0xff]  ;;  %v2201_v62 = vld [vmem:[#allocation9 + $0x90] sm:$0xff]  ;;  %v2183_v0 = vld [vmem:[#allocation9] sm:$0xff] }
  0x33   :  { %v2209_v63 = vld [vmem:[#allocation9 + $0xd0] sm:$0xff]  ;;  %v2191_v1 = vld [vmem:[#allocation9 + $0x40] sm:$0xff]  ;;  %v2200_v5 = vld [vmem:[#allocation9 + $0x88] sm:$0xff] }
  0x34   :  { %458 = vmatpush.bf16.msrb.mxu0 %v1841_v31  ;;  %v2208_v7 = vld [vmem:[#allocation9 + $0xc8] sm:$0xff]  ;;  %v2199_v8 = vld [vmem:[#allocation9 + $0x80] sm:$0xff]  ;;  %v2238_v12 = vld [vmem:[#allocation9 + $0x1b8] sm:$0xff] }
  0x35   :  { %484 = vmatpush.bf16.msrb.mxu2 %v1849_v33  ;;  %v2207_v9 = vld [vmem:[#allocation9 + $0xc0] sm:$0xff]  ;;  %v2222_v17 = vld [vmem:[#allocation9 + $0x138] sm:$0xff]  ;;  %v2237_v21 = vld [vmem:[#allocation9 + $0x1b0] sm:$0xff] }
  0x36   :  { %471 = vmatpush.bf16.msrb.mxu1 %v1845_v32  ;;  %497 = vmatpush.bf16.msrb.mxu3 %v1853_v34  ;;  %v2246_v18 = vld [vmem:[#allocation9 + $0x1f8] sm:$0xff] }
  0x37   :  { %v2230_v20 = vld [vmem:[#allocation9 + $0x178] sm:$0xff] }
  0x3f   :  { %1886 = vmatmul.msk.bf16.vlgmr.msra.gmra.mxu0 %vm180_vm0, %v298_v36  ;;  %1887 = vmatmul.msk.bf16.vlgmr.msra.gmra.mxu1 %vm180_vm0, %v298_v36 }
  0x40   :  { %1888 = vmatmul.msk.bf16.vlgmr.msra.gmra.mxu2 %vm180_vm0, %v298_v36  ;;  %1409 = vmatpush.bf16.msra.mxu0 %v2190_v26 }
  0x41   :  { %1889 = vmatmul.msk.bf16.vlgmr.msra.gmra.mxu3 %vm180_vm0, %v298_v36  ;;  %1438 = vmatpush.bf16.msra.mxu1 %v2198_v37 }
  0x42   :  { %1467 = vmatpush.bf16.msra.mxu2 %v2206_v40  ;;  %1496 = vmatpush.bf16.msra.mxu3 %v2214_v41 }
  0x44   :  { %1410 = vmatpush.bf16.msra.mxu0 %v2189_v38 }
  0x45   :  { %1439 = vmatpush.bf16.msra.mxu1 %v2197_v39 }
  0x46   :  { %1468 = vmatpush.bf16.msra.mxu2 %v2205_v44  ;;  %1497 = vmatpush.bf16.msra.mxu3 %v2213_v45 }
  0x48   :  { %1411 = vmatpush.bf16.msra.mxu0 %v2188_v42 }
  0x49   :  { %1440 = vmatpush.bf16.msra.mxu1 %v2196_v43 }
  0x4a   :  { %1469 = vmatpush.bf16.msra.mxu2 %v2204_v48  ;;  %1498 = vmatpush.bf16.msra.mxu3 %v2212_v49 }
  0x4c   :  { %1412 = vmatpush.bf16.msra.mxu0 %v2187_v46 }
  0x4d   :  { %1441 = vmatpush.bf16.msra.mxu1 %v2195_v47 }
  0x4e   :  { %1470 = vmatpush.bf16.msra.mxu2 %v2203_v52  ;;  %1499 = vmatpush.bf16.msra.mxu3 %v2211_v53 }
  0x4f   :  { %1890 = vmatmul.msk.bf16.vlgmr.msrb.gmra.mxu0 %vm180_vm0, %v298_v36  ;;  %1891 = vmatmul.msk.bf16.vlgmr.msrb.gmra.mxu1 %vm180_vm0, %v298_v36 }
  0x50   :  { %1892 = vmatmul.msk.bf16.vlgmr.msrb.gmra.mxu2 %vm180_vm0, %v298_v36  ;;  %1413 = vmatpush.bf16.msra.mxu0 %v2186_v50 }
  0x51   :  { %1893 = vmatmul.msk.bf16.vlgmr.msrb.gmra.mxu3 %vm180_vm0, %v298_v36  ;;  %1442 = vmatpush.bf16.msra.mxu1 %v2194_v51  ;;  %vm563_vm0 = vcmask 1045506  }
  0x52   :  { %1471 = vmatpush.bf16.msra.mxu2 %v2202_v58  ;;  %1500 = vmatpush.bf16.msra.mxu3 %v2210_v59 }
  0x54   :  { %1414 = vmatpush.bf16.msra.mxu0 %v2185_v55 }
  0x55   :  { %1443 = vmatpush.bf16.msra.mxu1 %v2193_v56 }
  0x56   :  { %1472 = vmatpush.bf16.msra.mxu2 %v2201_v62  ;;  %1501 = vmatpush.bf16.msra.mxu3 %v2209_v63  ;;  %v2221_v62 = vld [vmem:[#allocation9 + $0x130] sm:$0xff] }
  0x57   :  { %v2245_v63 = vld [vmem:[#allocation9 + $0x1f0] sm:$0xff] }
  0x58   :  { %1415 = vmatpush.bf16.msra.mxu0 %v2184_v60 }
  0x59   :  { %1444 = vmatpush.bf16.msra.mxu1 %v2192_v61 }
  0x5a   :  { %1473 = vmatpush.bf16.msra.mxu2 %v2200_v5  ;;  %1502 = vmatpush.bf16.msra.mxu3 %v2208_v7 }
  0x5c   :  { %1416 = vmatpush.bf16.msra.mxu0 %v2183_v0  ;;  %v2229_v0 = vld [vmem:[#allocation9 + $0x170] sm:$0xff] }
  0x5d   :  { %1445 = vmatpush.bf16.msra.mxu1 %v2191_v1 }
  0x5e   :  { %1474 = vmatpush.bf16.msra.mxu2 %v2199_v8  ;;  %1503 = vmatpush.bf16.msra.mxu3 %v2207_v9 }
  0x60   :  { %1525 = vmatpush.bf16.msrb.mxu0 %v2222_v17  ;;  %v2236_v17 = vld [vmem:[#allocation9 + $0x1a8] sm:$0xff] }
  0x61   :  { %1554 = vmatpush.bf16.msrb.mxu1 %v2230_v20 }
  0x62   :  { %1583 = vmatpush.bf16.msrb.mxu2 %v2238_v12  ;;  %1612 = vmatpush.bf16.msrb.mxu3 %v2246_v18  ;;  %v2220_v18 = vld [vmem:[#allocation9 + $0x128] sm:$0xff] }
  0x64   :  { %1526 = vmatpush.bf16.msrb.mxu0 %v2221_v62 }
  0x65   :  { %1555 = vmatpush.bf16.msrb.mxu1 %v2229_v0 }
  0x66   :  { %1584 = vmatpush.bf16.msrb.mxu2 %v2237_v21  ;;  %1613 = vmatpush.bf16.msrb.mxu3 %v2245_v63 }
  0x68   :  { %1527 = vmatpush.bf16.msrb.mxu0 %v2220_v18 }
  0x6a   :  { %1585 = vmatpush.bf16.msrb.mxu2 %v2236_v17 }
  0x9c   :  { %v2473_v54 = vpop.f32.mrf.mxu0  ;;  %v206_v57 = vpop.f32.mrf.mxu1 }
  0x9d   :  { %v519_v10 = vrot.slane %v206_v57, 7 }
  0x9f   :  { %v541_v22 = vsel %vm540_vm4, %v2473_v54, %v519_v10  ;;  %v555_v23 = vsel %vm528_vm1, %v2473_v54, %v519_v10  ;;  %v566_v24 = vsel %vm542_vm5, %v2473_v54, %v519_v10  ;;  %v585_v25 = vsel %vm546_vm6, %v2473_v54, %v519_v10 }
  0xa0   :  { %v593_v27 = vsel %vm534_vm3, %v2473_v54, %v519_v10  ;;  %v577_v35 = vsel %vm532_vm2, %v2473_v54, %v519_v10  ;;  %v601_v36 = vsel %vm548_vm7, %v519_v10, %v2473_v54  ;;  %v527_v37 = vsel %vm526_vm8, %v2473_v54, %v519_v10 }
  0xa3   :  { %v219_v2 = vpop.f32.mrf.mxu2 }
  0xa4   :  { %v232_v3 = vpop.f32.mrf.mxu3  ;;  %v195_v4 = vpop.f32.mrf.mxu0  ;;  %v520_v13 = vrot.slane %v219_v2, 6 }
  0xa5   :  { %v208_v6 = vpop.f32.mrf.mxu1  ;;  %v521_v14 = vrot.slane %v232_v3, 5 }
  0xa7   :  { %v543_v28 = vsel %vm542_vm5, %v520_v13, %v521_v14  ;;  %v556_v29 = vsel %vm532_vm2, %v520_v13, %v521_v14  ;;  %v567_v30 = vsel %vm546_vm6, %v520_v13, %v521_v14  ;;  %v586_v31 = vsel %vm548_vm7, %v521_v14, %v520_v13 }
  0xa8   :  { %v594_v32 = vsel %vm526_vm8, %v520_v13, %v521_v14  ;;  %v578_v26 = vsel %vm534_vm3, %v520_v13, %v521_v14  ;;  %v545_v38 = vsel %vm544_vm9, %v541_v22, %v543_v28  ;;  %v558_v39 = vsel %vm2813_vm11, %v555_v23, %v556_v29 }
  0xa9   :  { %v569_v40 = vsel %vm2812_vm13, %v566_v24, %v567_v30  ;;  %v602_v41 = vsel %vm540_vm4, %v520_v13, %v521_v14  ;;  %v587_v43 = vsel %vm2814_vm14, %v585_v25, %v586_v31  ;;  %v2503_v44 = vsel %vm561_vm12, %v594_v32, %v593_v27  ;;  %v2228_v27 = vld [vmem:[#allocation9 + $0x168] sm:$0xff] }
  0xaa   :  { %v529_v48 = vsel %vm528_vm1, %v520_v13, %v521_v14  ;;  %vm2815_vm13 = vcmask 1046529   ;;  %vm2816_vm11 = vcmask 1044481   ;;  %1556 = vmatpush.bf16.msrb.mxu1 %v2228_v27  ;;  %v2227_v27 = vld [vmem:[#allocation9 + $0x160] sm:$0xff] }
  0xab   :  { %v221_v11 = vpop.f32.mrf.mxu2  ;;  %v2510_v54 = vsel %vm2815_vm13, %v602_v41, %v601_v36  ;;  %v531_v22 = vsel %vm530_vm15, %v527_v37, %v529_v48 }
  0xac   :  { %v234_v15 = vpop.f32.mrf.mxu3  ;;  %v245_v16 = vpop.f32.mrf.mxu0 }
  0xad   :  { %v258_v19 = vpop.f32.mrf.mxu1  ;;  %v522_v33 = vrot.slane %v245_v16, 4 }
  0xae   :  { %v523_v34 = vrot.slane %v258_v19, 3  ;;  %v2244_v19 = vld [vmem:[#allocation9 + $0x1e8] sm:$0xff]  ;;  %1557 = vmatpush.bf16.msrb.mxu1 %v2227_v27 }
  0xaf   :  { %1614 = vmatpush.bf16.msrb.mxu3 %v2244_v19 }
  0xb0   :  { %v547_v49 = vsel %vm546_vm6, %v522_v33, %v523_v34  ;;  %v559_v50 = vsel %vm534_vm3, %v522_v33, %v523_v34  ;;  %v570_v51 = vsel %vm548_vm7, %v523_v34, %v522_v33  ;;  %v580_v55 = vsel %vm526_vm8, %v522_v33, %v523_v34 }
  0xb1   :  { %v588_v56 = vsel %vm540_vm4, %v522_v33, %v523_v34  ;;  %v596_v57 = vsel %vm528_vm1, %v522_v33, %v523_v34  ;;  %v604_v58 = vsel %vm542_vm5, %v522_v33, %v523_v34  ;;  %v533_v8 = vsel %vm532_vm2, %v522_v33, %v523_v34  ;;  %v2235_v33 = vld [vmem:[#allocation9 + $0x1a0] sm:$0xff] }
  0xb2   :  { %1586 = vmatpush.bf16.msrb.mxu2 %v2235_v33 }
  0xb3   :  { %v271_v42 = vpop.f32.mrf.mxu2 }
  0xb4   :  { %v524_v45 = vrot.slane %v271_v42, 2  ;;  %v284_v46 = vpop.f32.mrf.mxu3  ;;  %v247_v47 = vpop.f32.mrf.mxu0 }
  0xb5   :  { %v525_v52 = vrot.slane %v284_v46, 1  ;;  %v260_v53 = vpop.f32.mrf.mxu1 }
  0xb7   :  { %v549_v59 = vsel %vm548_vm7, %v525_v52, %v524_v45  ;;  %v560_v60 = vsel %vm526_vm8, %v524_v45, %v525_v52  ;;  %v571_v61 = vsel %vm540_vm4, %v524_v45, %v525_v52  ;;  %v589_v4 = vsel %vm542_vm5, %v524_v45, %v525_v52  ;;  %vm2817_vm7 = vmmov %vm2816_vm11 }
  0xb8   :  { %v551_v1 = vsel %vm2814_vm14, %v547_v49, %v549_v59  ;;  %v562_v2 = vsel %vm561_vm12, %v560_v60, %v559_v50  ;;  %v573_v3 = vsel %vm2815_vm13, %v571_v61, %v570_v51  ;;  %v581_v6 = vsel %vm528_vm1, %v524_v45, %v525_v52 }
  0xb9   :  { %v553_v5 = vsel %vm2816_vm11, %v545_v38, %v551_v1  ;;  %v590_v7 = vsel %vm544_vm9, %v588_v56, %v589_v4  ;;  %v564_v9 = vsel %vm563_vm0, %v558_v39, %v562_v2  ;;  %v575_v10 = vsel %vm574_vm10, %v569_v40, %v573_v3 }
  0xba   :  { %v591_v11 = vsel %vm2817_vm7, %v590_v7, %v587_v43  ;;  %vm538_vm8 = vcmask 1043456   ;;  %v2530_v12 = vrot.slane %v553_v5, 1  ;;  %v597_v13 = vsel %vm532_vm2, %v524_v45, %v525_v52 }
  0xbb   :  { %v605_v14 = vsel %vm546_vm6, %v524_v45, %v525_v52  ;;  %v273_v15 = vpop.f32.mrf.mxu2  ;;  %v535_v16 = vsel %vm534_vm3, %v524_v45, %v525_v52  ;;  %vm2818_vm9 = vcmask 1045508   ;;  %v582_v25 = vsel %vm530_vm15, %v580_v55, %v581_v6 }
  0xbc   :  { %v286_v20 = vpop.f32.mrf.mxu3  ;;  %v2535_v21 = vpop.f32.mrf.mxu0  ;;  %v537_v23 = vsel %vm2818_vm9, %v533_v8, %v535_v16  ;;  %vm2819_vm11 = vmmov %vm2818_vm9  ;;  %v2541_v28 = vrot.slane %v564_v9, 2  ;;  %v2543_v29 = vrot.slane %v575_v10, 3  ;;  %v2545_v30 = vrot.slane %v591_v11, 5 }
  0xbd   :  { %v579_v24 = vsel %vm2819_vm11, %v577_v35, %v578_v26  ;;  %v2547_v31 = vpop.f32.mrf.mxu1  ;;  %v2550_v32 = vsel %vm538_vm8, %v531_v22, %v537_v23  ;;  %vm2820_vm12 = vcmask 1043458   ;;  %vm2821_vm14 = vcmask 1044483   ;;  %v2219_v20 = vld [vmem:[#allocation9 + $0x120] sm:$0xff] }
  0xbe   :  { %v598_v34 = vsel %vm2820_vm12, %v596_v57, %v597_v13  ;;  %v606_v35 = vsel %vm2821_vm14, %v604_v58, %v605_v14  ;;  %v583_v36 = vsel %vm538_vm8, %v582_v25, %v579_v24  ;;  %v609_v26 = vperm.slane %v2550_v32, 0  ;;  %v2243_v25 = vld [vmem:[#allocation9 + $0x1e0] sm:$0xff]  ;;  %1528 = vmatpush.bf16.msrb.mxu0 %v2219_v20 }
  0xbf   :  { %v617_v37 = vperm.slane %v2530_v12, 0  ;;  %v610_v38 = vperm.slane %v2550_v32, 1  ;;  %v618_v39 = vperm.slane %v2530_v12, 1  ;;  %v611_v40 = vperm.slane %v2550_v32, 2  ;;  %1615 = vmatpush.bf16.msrb.mxu3 %v2243_v25 }
  0xc0   :  { %v737_v41 = vsub.f32 %v609_v26, %v2535_v21  ;;  %v619_v42 = vperm.slane %v2530_v12, 2  ;;  %v612_v43 = vperm.slane %v2550_v32, 3  ;;  %v620_v45 = vperm.slane %v2530_v12, 3 }
  0xc1   :  { %v745_v46 = vsub.f32 %v617_v37, %v2535_v21  ;;  %v738_v47 = vsub.f32 %v610_v38, %v2547_v31  ;;  %v746_v48 = vsub.f32 %v618_v39, %v2547_v31  ;;  %v625_v49 = vperm.slane %v2541_v28, 0 }
  0xc2   :  { %v801_v50 = vand.u32 2147483647, %v737_v41  ;;  %v633_v51 = vperm.slane %v2543_v29, 0  ;;  %v626_v52 = vperm.slane %v2541_v28, 1  ;;  %v634_v53 = vperm.slane %v2543_v29, 1  ;;  %v2218_v41 = vld [vmem:[#allocation9 + $0x118] sm:$0xff] }
  0xc3   :  { %v2571_v55 = vpop.f32.mrf.mxu2  ;;  %v809_v56 = vand.u32 2147483647, %v745_v46  ;;  %v802_v57 = vand.u32 2147483647, %v738_v47  ;;  %v810_v58 = vand.u32 2147483647, %v746_v48  ;;  %v753_v59 = vsub.f32 %v625_v49, %v2535_v21  ;;  %1529 = vmatpush.bf16.msrb.mxu0 %v2218_v41 }
  0xc4   :  { %v2574_v60 = vpop.f32.mrf.mxu3  ;;  %v410_v61 = vpop.f32.mrf.mxu0  ;;  %v739_v62 = vsub.f32 %v611_v40, %v2571_v55  ;;  %v747_v63 = vsub.f32 %v619_v42, %v2571_v55  ;;  %v761_v0 = vsub.f32 %v633_v51, %v2535_v21  ;;  %v2580_v1 = vsub.f32 %v626_v52, %v2547_v31  ;;  %v2234_v40 = vld [vmem:[#allocation9 + $0x198] sm:$0xff] }
  0xc5   :  { %v865_v2 = vpack.c.bf16 %v809_v56, %v801_v50  ;;  %v866_v3 = vpack.c.bf16 %v810_v58, %v802_v57  ;;  %v423_v4 = vpop.f32.mrf.mxu1  ;;  %v740_v5 = vsub.f32 %v612_v43, %v2574_v60  ;;  %v748_v6 = vsub.f32 %v620_v45, %v2574_v60  ;;  %v2242_v49 = vld [vmem:[#allocation9 + $0x1d8] sm:$0xff]  ;;  %1587 = vmatpush.bf16.msrb.mxu2 %v2234_v40  ;;  %v2233_v58 = vld [vmem:[#allocation9 + $0x190] sm:$0xff] }
  0xc6   :  { %v2584_v7 = vrot.slane %v583_v36, 4  ;;  %v803_v8 = vand.u32 2147483647, %v739_v62  ;;  %v811_v9 = vand.u32 2147483647, %v747_v63  ;;  %v762_v10 = vsub.f32 %v634_v53, %v2547_v31  ;;  %v2226_v50 = vld [vmem:[#allocation9 + $0x158] sm:$0xff]  ;;  %1616 = vmatpush.bf16.msrb.mxu3 %v2242_v49 }
  0xc7   :  { %v599_v11 = vsel %vm563_vm0, %v598_v34, %v2503_v44  ;;  %v607_v13 = vsel %vm574_vm10, %v606_v35, %v2510_v54  ;;  %1417 = vmatmul.bf16.vlgmr.msra.gmra.mxu0 %v865_v2  ;;  %1446 = vmatmul.bf16.vlgmr.msra.gmra.mxu1 %v866_v3  ;;  %v804_v14 = vand.u32 2147483647, %v740_v5  ;;  %v812_v15 = vand.u32 2147483647, %v748_v6  ;;  %v2225_v49 = vld [vmem:[#allocation9 + $0x150] sm:$0xff] }
  0xc8   :  { %v867_v16 = vpack.c.bf16 %v811_v9, %v803_v8  ;;  %v817_v17 = vand.u32 2147483647, %v753_v59  ;;  %v825_v18 = vand.u32 2147483647, %v761_v0  ;;  %v627_v19 = vperm.slane %v2541_v28, 2  ;;  %1558 = vmatpush.bf16.msrb.mxu1 %v2226_v50 }
  0xc9   :  { %v868_v22 = vpack.c.bf16 %v812_v15, %v804_v14  ;;  %v818_v23 = vand.u32 2147483647, %v2580_v1  ;;  %v635_v24 = vperm.slane %v2543_v29, 2  ;;  %v628_v44 = vperm.slane %v2541_v28, 3  ;;  %1588 = vmatpush.bf16.msrb.mxu2 %v2233_v58 }
  0xca   :  { %1475 = vmatmul.bf16.vlgmr.msra.gmra.mxu2 %v867_v16  ;;  %v826_v54 = vand.u32 2147483647, %v762_v10  ;;  %v2596_v33 = vsub.f32 %v627_v19, %v2571_v55  ;;  %v636_v34 = vperm.slane %v2543_v29, 3  ;;  %v641_v35 = vperm.slane %v2584_v7, 0 }
  0xcb   :  { %1504 = vmatmul.bf16.vlgmr.msra.gmra.mxu3 %v868_v22  ;;  %v436_v36 = vpop.f32.mrf.mxu2  ;;  %v763_v26 = vsub.f32 %v635_v24, %v2571_v55  ;;  %v2602_v37 = vsub.f32 %v628_v44, %v2574_v60  ;;  %v649_v38 = vperm.slane %v2545_v30, 0  ;;  %v642_v39 = vperm.slane %v2584_v7, 1 }
  0xcc   :  { %v2606_v42 = vrot.slane %v599_v11, 6  ;;  %v449_v43 = vpop.f32.mrf.mxu3  ;;  %v2608_v45 = vpop.f32.mrf.mxu0  ;;  %v764_v46 = vsub.f32 %v636_v34, %v2574_v60  ;;  %v769_v47 = vsub.f32 %v641_v35, %v2535_v21  ;;  %v650_v48 = vperm.slane %v2545_v30, 1  ;;  %1559 = vmatpush.bf16.msrb.mxu1 %v2225_v49 }
  0xcd   :  { %v2613_v51 = vrot.slane %v607_v13, 7  ;;  %v2615_v52 = vpop.f32.mrf.mxu1  ;;  %v873_v53 = vpack.c.bf16 %v825_v18, %v817_v17  ;;  %v777_v56 = vsub.f32 %v649_v38, %v2535_v21  ;;  %v770_v57 = vsub.f32 %v642_v39, %v2547_v31 }
  0xce   :  { %v819_v59 = vand.u32 2147483647, %v2596_v33  ;;  %v827_v61 = vand.u32 2147483647, %v763_v26  ;;  %v778_v62 = vsub.f32 %v650_v48, %v2547_v31  ;;  %v643_v63 = vperm.slane %v2584_v7, 2  ;;  %v2241_v48 = vld [vmem:[#allocation9 + $0x1d0] sm:$0xff] }
  0xcf   :  { %v874_v0 = vpack.c.bf16 %v826_v54, %v818_v23  ;;  %v820_v1 = vand.u32 2147483647, %v2602_v37  ;;  %v828_v2 = vand.u32 2147483647, %v764_v46  ;;  %v651_v3 = vperm.slane %v2545_v30, 2  ;;  %1617 = vmatpush.bf16.msrb.mxu3 %v2241_v48 }
  0xd0   :  { %v833_v4 = vand.u32 2147483647, %v769_v47  ;;  %v841_v5 = vand.u32 2147483647, %v777_v56  ;;  %v771_v6 = vsub.f32 %v643_v63, %v2571_v55  ;;  %v644_v8 = vperm.slane %v2584_v7, 3  ;;  %v2217_v47 = vld [vmem:[#allocation9 + $0x110] sm:$0xff] }
  0xd1   :  { %v834_v9 = vand.u32 2147483647, %v770_v57  ;;  %v779_v10 = vsub.f32 %v651_v3, %v2571_v55  ;;  %v652_v11 = vperm.slane %v2545_v30, 3  ;;  %v657_v13 = vperm.slane %v2606_v42, 0  ;;  %1530 = vmatpush.bf16.msrb.mxu0 %v2217_v47  ;;  %v2232_v3 = vld [vmem:[#allocation9 + $0x188] sm:$0xff] }
  0xd2   :  { %v842_v14 = vand.u32 2147483647, %v778_v62  ;;  %v835_v15 = vand.u32 2147483647, %v771_v6  ;;  %v772_v16 = vsub.f32 %v644_v8, %v2574_v60  ;;  %v665_v17 = vperm.slane %v2613_v51, 0  ;;  %1589 = vmatpush.bf16.msrb.mxu2 %v2232_v3 }
  0xd3   :  { %v2631_v18 = vpop.f32.mrf.mxu2  ;;  %v843_v19 = vand.u32 2147483647, %v779_v10  ;;  %v780_v20 = vsub.f32 %v652_v11, %v2574_v60  ;;  %v785_v22 = vsub.f32 %v657_v13, %v2535_v21  ;;  %v658_v23 = vperm.slane %v2606_v42, 1  ;;  %v2224_v11 = vld [vmem:[#allocation9 + $0x148] sm:$0xff] }
  0xd4   :  { %v2636_v24 = vpop.f32.mrf.mxu3  ;;  %v836_v44 = vand.u32 2147483647, %v772_v16  ;;  %v793_v25 = vsub.f32 %v665_v17, %v2535_v21  ;;  %v666_v27 = vperm.slane %v2613_v51, 1  ;;  %v659_v54 = vperm.slane %v2606_v42, 2  ;;  %v462_v33 = vpop.f32.mrf.mxu0  ;;  %1560 = vmatpush.bf16.msrb.mxu1 %v2224_v11 }
  0xd5   :  { %v875_v34 = vpack.c.bf16 %v827_v61, %v819_v59  ;;  %v844_v35 = vand.u32 2147483647, %v780_v20  ;;  %v849_v36 = vand.u32 2147483647, %v785_v22  ;;  %v786_v26 = vsub.f32 %v658_v23, %v2547_v31  ;;  %v475_v37 = vpop.f32.mrf.mxu1  ;;  %v2215_v20 = vld [vmem:[#allocation9 + $0x100] sm:$0xff] }
  0xd6   :  { %v857_v38 = vand.u32 2147483647, %v793_v25  ;;  %v794_v39 = vsub.f32 %v666_v27, %v2547_v31  ;;  %v667_v40 = vperm.slane %v2613_v51, 2  ;;  %v2645_v41 = vsub.f32 %v659_v54, %v2571_v55  ;;  %v2223_v22 = vld [vmem:[#allocation9 + $0x140] sm:$0xff] }
  0xd7   :  { %1422 = vmatmul.bf16.gmra.mxu0 %v873_v53  ;;  %1451 = vmatmul.bf16.gmra.mxu1 %v874_v0  ;;  %v876_v21 = vpack.c.bf16 %v828_v2, %v820_v1  ;;  %v2647_v43 = vpack.c.bf16 %v841_v5, %v833_v4  ;;  %v2649_v46 = vpack.c.bf16 %v842_v14, %v834_v9  ;;  %v850_v31 = vand.u32 2147483647, %v786_v26  ;;  %v2216_v4 = vld [vmem:[#allocation9 + $0x108] sm:$0xff]  ;;  %v2231_v23 = vld [vmem:[#allocation9 + $0x180] sm:$0xff] }
  0xd8   :  { %v2651_v50 = vpack.c.bf16 %v843_v19, %v835_v15  ;;  %v2653_v56 = vpack.c.bf16 %v844_v35, %v836_v44  ;;  %v2656_v57 = vsub.f32 %v667_v40, %v2571_v55  ;;  %v858_v58 = vand.u32 2147483647, %v794_v39  ;;  %v2240_v5 = vld [vmem:[#allocation9 + $0x1c8] sm:$0xff]  ;;  %1531 = vmatpush.bf16.msrb.mxu0 %v2216_v4  ;;  %1590 = vmatpush.bf16.msrb.mxu2 %v2231_v23 }
  0xd9   :  { %v660_v53 = vperm.slane %v2606_v42, 3  ;;  %v613_v59 = vperm.slane %v2550_v32, 4  ;;  %v621_v61 = vperm.slane %v2530_v12, 4  ;;  %v2661_v62 = vpack.c.bf16 %v857_v38, %v849_v36  ;;  %1618 = vmatpush.bf16.msrb.mxu3 %v2240_v5  ;;  %1561 = vmatpush.bf16.msrb.mxu1 %v2223_v22 }
  0xda   :  { %1480 = vmatmul.bf16.gmra.mxu2 %v875_v34  ;;  %v851_v63 = vand.u32 2147483647, %v2645_v41  ;;  %v614_v0 = vperm.slane %v2550_v32, 5  ;;  %v622_v55 = vperm.slane %v2530_v12, 5  ;;  %v668_v1 = vperm.slane %v2613_v51, 3 }
  0xdb   :  { %1509 = vmatmul.bf16.gmra.mxu3 %v876_v21  ;;  %v2668_v2 = vsub.f32 %v660_v53, %v2574_v60  ;;  %v488_v6 = vpop.f32.mrf.mxu2  ;;  %v741_v8 = vsub.f32 %v613_v59, %v2608_v45  ;;  %v749_v9 = vsub.f32 %v621_v61, %v2608_v45  ;;  %v859_v10 = vand.u32 2147483647, %v2656_v57 }
  0xdc   :  { %v742_v13 = vsub.f32 %v614_v0, %v2615_v52  ;;  %v750_v14 = vsub.f32 %v622_v55, %v2615_v52  ;;  %v501_v15 = vpop.f32.mrf.mxu3  ;;  %v615_v16 = vperm.slane %v2550_v32, 6  ;;  %v2676_v17 = vpack.c.bf16 %v858_v58, %v850_v31  ;;  %1532 = vmatpush.bf16.msrb.mxu0 %v2215_v20 }
  0xdd   :  { %v2679_v19 = vsub.f32 %v668_v1, %v2574_v60  ;;  %v805_v44 = vand.u32 2147483647, %v741_v8  ;;  %v623_v25 = vperm.slane %v2530_v12, 6  ;;  %v813_v27 = vand.u32 2147483647, %v749_v9 }
  0xde   :  { %v806_v54 = vand.u32 2147483647, %v742_v13  ;;  %v814_v33 = vand.u32 2147483647, %v750_v14  ;;  %v743_v34 = vsub.f32 %v615_v16, %v2631_v18  ;;  %v852_v35 = vand.u32 2147483647, %v2668_v2 }
  0xdf   :  { %v751_v60 = vsub.f32 %v623_v25, %v2631_v18  ;;  %v616_v36 = vperm.slane %v2550_v32, 7  ;;  %v624_v26 = vperm.slane %v2530_v12, 7  ;;  %v2687_v37 = vpack.c.bf16 %v813_v27, %v805_v44  ;;  %v2239_v16 = vld [vmem:[#allocation9 + $0x1c0] sm:$0xff] }
  0xe0   :  { %v2689_v38 = vpack.c.bf16 %v814_v33, %v806_v54  ;;  %v807_v39 = vand.u32 2147483647, %v743_v34  ;;  %v629_v40 = vperm.slane %v2541_v28, 4  ;;  %v637_v49 = vperm.slane %v2543_v29, 4  ;;  %1619 = vmatpush.bf16.msrb.mxu3 %v2239_v16 }
  0xe1   :  { %v815_v21 = vand.u32 2147483647, %v751_v60  ;;  %v744_v47 = vsub.f32 %v616_v36, %v2636_v24  ;;  %v752_v48 = vsub.f32 %v624_v26, %v2636_v24  ;;  %v630_v12 = vperm.slane %v2541_v28, 5 }
  0xe2   :  { %v757_v32 = vsub.f32 %v629_v40, %v2608_v45  ;;  %v638_v31 = vperm.slane %v2543_v29, 5  ;;  %v631_v58 = vperm.slane %v2541_v28, 6  ;;  %v765_v0 = vsub.f32 %v637_v49, %v2608_v45 }
  0xe3   :  { %v2699_v53 = vpack.c.bf16 %v815_v21, %v807_v39  ;;  %v808_v59 = vand.u32 2147483647, %v744_v47  ;;  %v816_v61 = vand.u32 2147483647, %v752_v48  ;;  %v758_v1 = vsub.f32 %v630_v12, %v2615_v52 }
  0xe4   :  { %v821_v55 = vand.u32 2147483647, %v757_v32  ;;  %v766_v3 = vsub.f32 %v638_v31, %v2615_v52  ;;  %v639_v4 = vperm.slane %v2543_v29, 6  ;;  %v829_v6 = vand.u32 2147483647, %v765_v0 }
  0xe5   :  { %v2705_v5 = vpack.c.bf16 %v816_v61, %v808_v59  ;;  %v759_v8 = vsub.f32 %v631_v58, %v2631_v18  ;;  %v632_v9 = vperm.slane %v2541_v28, 7  ;;  %v822_v11 = vand.u32 2147483647, %v758_v1 }
  0xe6   :  { %v830_v13 = vand.u32 2147483647, %v766_v3  ;;  %v767_v14 = vsub.f32 %v639_v4, %v2631_v18  ;;  %v640_v15 = vperm.slane %v2543_v29, 7  ;;  %v2713_v20 = vpack.c.bf16 %v829_v6, %v821_v55 }
  0xe7   :  { %1427 = vmatmul.bf16.gmra.mxu0 %v2647_v43  ;;  %1456 = vmatmul.bf16.gmra.mxu1 %v2649_v46  ;;  %v823_v22 = vand.u32 2147483647, %v759_v8  ;;  %v760_v23 = vsub.f32 %v632_v9, %v2636_v24  ;;  %v645_v44 = vperm.slane %v2584_v7, 4  ;;  %v653_v54 = vperm.slane %v2545_v30, 4 }
  0xe8   :  { %v2717_v25 = vpack.c.bf16 %v830_v13, %v822_v11  ;;  %v831_v28 = vand.u32 2147483647, %v767_v14  ;;  %v768_v27 = vsub.f32 %v640_v15, %v2636_v24  ;;  %v646_v46 = vperm.slane %v2584_v7, 5 }
  0xe9   :  { %v824_v29 = vand.u32 2147483647, %v760_v23  ;;  %v773_v43 = vsub.f32 %v645_v44, %v2608_v45  ;;  %v654_v33 = vperm.slane %v2545_v30, 5  ;;  %v781_v36 = vsub.f32 %v653_v54, %v2608_v45 }
  0xea   :  { %1485 = vmatmul.bf16.gmra.mxu2 %v2651_v50  ;;  %v2725_v34 = vpack.c.bf16 %v831_v28, %v823_v22  ;;  %v832_v60 = vand.u32 2147483647, %v768_v27  ;;  %v647_v26 = vperm.slane %v2584_v7, 6  ;;  %v774_v40 = vsub.f32 %v646_v46, %v2615_v52 }
  0xeb   :  { %1514 = vmatmul.bf16.gmra.mxu3 %v2653_v56  ;;  %v837_v39 = vand.u32 2147483647, %v773_v43  ;;  %v782_v21 = vsub.f32 %v654_v33, %v2615_v52  ;;  %v655_v47 = vperm.slane %v2545_v30, 6  ;;  %v845_v49 = vand.u32 2147483647, %v781_v36 }
  0xec   :  { %v880_v48 = vpack.c.bf16 %v832_v60, %v824_v29  ;;  %v775_v50 = vsub.f32 %v647_v26, %v2631_v18  ;;  %v648_v32 = vperm.slane %v2584_v7, 7  ;;  %v838_v12 = vand.u32 2147483647, %v774_v40 }
  0xed   :  { %v846_v31 = vand.u32 2147483647, %v782_v21  ;;  %v783_v58 = vsub.f32 %v655_v47, %v2631_v18  ;;  %v656_v59 = vperm.slane %v2545_v30, 7  ;;  %v885_v56 = vpack.c.bf16 %v845_v49, %v837_v39 }
  0xee   :  { %v839_v61 = vand.u32 2147483647, %v775_v50  ;;  %v776_v0 = vsub.f32 %v648_v32, %v2636_v24  ;;  %v661_v55 = vperm.slane %v2606_v42, 4  ;;  %v669_v6 = vperm.slane %v2613_v51, 4 }
  0xef   :  { %v886_v1 = vpack.c.bf16 %v846_v31, %v838_v12  ;;  %v847_v3 = vand.u32 2147483647, %v783_v58  ;;  %v784_v4 = vsub.f32 %v656_v59, %v2636_v24  ;;  %v662_v9 = vperm.slane %v2606_v42, 5 }
  0xf0   :  { %v840_v8 = vand.u32 2147483647, %v776_v0  ;;  %v789_v7 = vsub.f32 %v661_v55, %v2608_v45  ;;  %v670_v11 = vperm.slane %v2613_v51, 5  ;;  %v797_v14 = vsub.f32 %v669_v6, %v2608_v45 }
  0xf1   :  { %v887_v30 = vpack.c.bf16 %v847_v3, %v839_v61  ;;  %v848_v13 = vand.u32 2147483647, %v784_v4  ;;  %v663_v15 = vperm.slane %v2606_v42, 6  ;;  %v790_v22 = vsub.f32 %v662_v9, %v2615_v52 }
  0xf2   :  { %v853_v16 = vand.u32 2147483647, %v789_v7  ;;  %v798_v23 = vsub.f32 %v670_v11, %v2615_v52  ;;  %v671_v44 = vperm.slane %v2613_v51, 6  ;;  %v861_v27 = vand.u32 2147483647, %v797_v14 }
  0xf3   :  { %v888_v28 = vpack.c.bf16 %v848_v13, %v840_v8  ;;  %v791_v54 = vsub.f32 %v663_v15, %v2631_v18  ;;  %v664_v29 = vperm.slane %v2606_v42, 7  ;;  %v854_v43 = vand.u32 2147483647, %v790_v22 }
  0xf4   :  { %v862_v46 = vand.u32 2147483647, %v798_v23  ;;  %v799_v33 = vsub.f32 %v671_v44, %v2631_v18  ;;  %v672_v45 = vperm.slane %v2613_v51, 7  ;;  %v860_v60 = vand.u32 2147483647, %v2679_v19 }
  0xf5   :  { %v893_v36 = vpack.c.bf16 %v861_v27, %v853_v16  ;;  %v855_v26 = vand.u32 2147483647, %v791_v54  ;;  %v792_v52 = vsub.f32 %v664_v29, %v2636_v24  ;;  %v891_v51 = vpack.c.bf16 %v859_v10, %v851_v63 }
  0xf6   :  { %v894_v39 = vpack.c.bf16 %v862_v46, %v854_v43  ;;  %v863_v40 = vand.u32 2147483647, %v799_v33  ;;  %v800_v21 = vsub.f32 %v672_v45, %v2636_v24  ;;  %v892_v47 = vpack.c.bf16 %v860_v60, %v852_v35 }
  0xf7   :  { %1432 = vmatmul.bf16.gmra.mxu0 %v2661_v62  ;;  %1461 = vmatmul.bf16.gmra.mxu1 %v2676_v17  ;;  %v856_v42 = vand.u32 2147483647, %v792_v52 }
  0xf8   :  { %v895_v18 = vpack.c.bf16 %v863_v40, %v855_v26  ;;  %v864_v19 = vand.u32 2147483647, %v800_v21 }
  0xfa   :  { %1490 = vmatmul.bf16.gmra.mxu2 %v891_v51  ;;  %v896_v49 = vpack.c.bf16 %v864_v19, %v856_v42 }
  0xfb   :  { %1519 = vmatmul.bf16.gmra.mxu3 %v892_v47 }
 0x107   :  { %1533 = vmatmul.bf16.vlgmr.msrb.gmra.mxu0 %v2687_v37  ;;  %1562 = vmatmul.bf16.vlgmr.msrb.gmra.mxu1 %v2689_v38 }
 0x10a   :  { %1591 = vmatmul.bf16.vlgmr.msrb.gmra.mxu2 %v2699_v53 }
 0x10b   :  { %1620 = vmatmul.bf16.vlgmr.msrb.gmra.mxu3 %v2705_v5 }
 0x117   :  { %1538 = vmatmul.bf16.gmra.mxu0 %v2713_v20  ;;  %1567 = vmatmul.bf16.gmra.mxu1 %v2717_v25 }
 0x11a   :  { %1596 = vmatmul.bf16.gmra.mxu2 %v2725_v34 }
 0x11b   :  { %1625 = vmatmul.bf16.gmra.mxu3 %v880_v48 }
 0x127   :  { %1543 = vmatmul.bf16.gmra.mxu0 %v885_v56  ;;  %1572 = vmatmul.bf16.gmra.mxu1 %v886_v1 }
 0x12a   :  { %1601 = vmatmul.bf16.gmra.mxu2 %v887_v30 }
 0x12b   :  { %1630 = vmatmul.bf16.gmra.mxu3 %v888_v28 }
 0x137   :  { %1548 = vmatmul.bf16.gmra.mxu0 %v893_v36  ;;  %1577 = vmatmul.bf16.gmra.mxu1 %v894_v39 }
 0x13a   :  { %1606 = vmatmul.bf16.gmra.mxu2 %v895_v18 }
 0x13b   :  { %1635 = vmatmul.bf16.gmra.mxu3 %v896_v49 }
 0x144   :  { %v1418_v24 = vpop.f32.mrf.mxu0  ;;  %v1447_v41 = vpop.f32.mrf.mxu1 }
 0x145   :  { %v1448_v57 = vadd.f32 %v1447_v41, %v1418_v24 }
 0x14c   :  { %v1420_v62 = vpop.f32.mrf.mxu0  ;;  %v1449_v63 = vpop.f32.mrf.mxu1 }
 0x14d   :  { %v1450_v2 = vadd.f32 %v1449_v63, %v1420_v62  ;;  %v1476_v10 = vpop.f32.mrf.mxu2 }
 0x14e   :  { %v1477_v17 = vadd.f32 %v1476_v10, %v1448_v57  ;;  %v1505_v35 = vpop.f32.mrf.mxu3 }
 0x150   :  { %v1506_v37 = vadd.f32 %v1505_v35, %v1477_v17 }
 0x154   :  { %v1423_v38 = vpop.f32.mrf.mxu0  ;;  %v1452_v53 = vpop.f32.mrf.mxu1 }
 0x155   :  { %v1453_v5 = vadd.f32 %v1452_v53, %v1423_v38  ;;  %v1478_v20 = vpop.f32.mrf.mxu2 }
 0x156   :  { %v1479_v25 = vadd.f32 %v1478_v20, %v1450_v2  ;;  %v1507_v34 = vpop.f32.mrf.mxu3 }
 0x158   :  { %v1508_v48 = vadd.f32 %v1507_v34, %v1479_v25 }
 0x15c   :  { %v1425_v50 = vpop.f32.mrf.mxu0  ;;  %v1454_v32 = vpop.f32.mrf.mxu1 }
 0x15d   :  { %v1455_v12 = vadd.f32 %v1454_v32, %v1425_v50  ;;  %v1481_v31 = vpop.f32.mrf.mxu2 }
 0x15e   :  { %v1482_v58 = vadd.f32 %v1481_v31, %v1453_v5  ;;  %v1510_v59 = vpop.f32.mrf.mxu3 }
 0x160   :  { %v1511_v56 = vadd.f32 %v1510_v59, %v1482_v58 }
 0x164   :  { %v1428_v61 = vpop.f32.mrf.mxu0  ;;  %v1457_v0 = vpop.f32.mrf.mxu1 }
 0x165   :  { %v1458_v55 = vadd.f32 %v1457_v0, %v1428_v61  ;;  %v1483_v1 = vpop.f32.mrf.mxu2 }
 0x166   :  { %v1484_v3 = vadd.f32 %v1483_v1, %v1455_v12  ;;  %v1512_v4 = vpop.f32.mrf.mxu3 }
 0x168   :  { %v1513_v6 = vadd.f32 %v1512_v4, %v1484_v3 }
 0x16c   :  { %v1430_v8 = vpop.f32.mrf.mxu0  ;;  %v1459_v7 = vpop.f32.mrf.mxu1 }
 0x16d   :  { %v1460_v9 = vadd.f32 %v1459_v7, %v1430_v8  ;;  %v1486_v11 = vpop.f32.mrf.mxu2 }
 0x16e   :  { %v1487_v30 = vadd.f32 %v1486_v11, %v1458_v55  ;;  %v1515_v13 = vpop.f32.mrf.mxu3 }
 0x170   :  { %v1516_v14 = vadd.f32 %v1515_v13, %v1487_v30 }
 0x174   :  { %v2771_v15 = vpop.f32.mrf.mxu0  ;;  %v2773_v16 = vpop.f32.mrf.mxu1 }
 0x175   :  { %v1488_v22 = vpop.f32.mrf.mxu2 }
 0x176   :  { %v1489_v23 = vadd.f32 %v1488_v22, %v1460_v9  ;;  %v1517_v44 = vpop.f32.mrf.mxu3 }
 0x178   :  { %v2775_v28 = vadd.f32 %v1517_v44, %v1489_v23 }
 0x17c   :  { %v2777_v27 = vpop.f32.mrf.mxu0  ;;  %v2779_v54 = vpop.f32.mrf.mxu1 }
 0x17d   :  { %v2781_v29 = vpop.f32.mrf.mxu2 }
 0x17e   :  { %v2783_v43 = vpop.f32.mrf.mxu3 }
 0x184   :  { %v1534_v46 = vpop.f32.mrf.mxu0  ;;  %v1563_v33 = vpop.f32.mrf.mxu1 }
 0x185   :  { %v2785_v45 = vpop.f32.mrf.mxu2  ;;  %v1535_v36 = vadd.f32 %v1534_v46, %v1506_v37 }
 0x186   :  { %v2787_v60 = vpop.f32.mrf.mxu3 }
 0x187   :  { %v1564_v26 = vadd.f32 %v1563_v33, %v1535_v36 }
 0x18c   :  { %v1536_v52 = vpop.f32.mrf.mxu0  ;;  %v1565_v39 = vpop.f32.mrf.mxu1 }
 0x18d   :  { %v1592_v40 = vpop.f32.mrf.mxu2  ;;  %v1537_v51 = vadd.f32 %v1536_v52, %v1508_v48 }
 0x18e   :  { %v1593_v21 = vadd.f32 %v1592_v40, %v1564_v26  ;;  %v1621_v42 = vpop.f32.mrf.mxu3 }
 0x18f   :  { %v1566_v47 = vadd.f32 %v1565_v39, %v1537_v51  ;;  %v1463_v51 = vadd.f32 %v2773_v16, %v2771_v15 }
 0x190   :  { %v1622_v18 = vadd.f32 %v1621_v42, %v1593_v21 }
 0x192   :  { %v1641_v19 = vmul.f32 1.442695, %v1622_v18 }
 0x194   :  { %2257 = vpow2.f32 %v1641_v19  ;;  %v1539_v49 = vpop.f32.mrf.mxu0  ;;  %v1568_v24 = vpop.f32.mrf.mxu1 }
 0x195   :  { %v1594_v41 = vpop.f32.mrf.mxu2  ;;  %v1540_v63 = vadd.f32 %v1539_v49, %v1511_v56 }
 0x196   :  { %v1595_v57 = vadd.f32 %v1594_v41, %v1566_v47  ;;  %v1623_v62 = vpop.f32.mrf.mxu3 }
 0x197   :  { %v1569_v37 = vadd.f32 %v1568_v24, %v1540_v63  ;;  %v1492_v24 = vadd.f32 %v2781_v29, %v1463_v51 }
 0x198   :  { %v1624_v2 = vadd.f32 %v1623_v62, %v1595_v57 }
 0x19a   :  { %v2258_v10 = vpop.eup %2257  ;;  %v1643_v17 = vmul.f32 1.442695, %v1624_v2 }
 0x19b   :  { %v1658_v35 = vrot.slane %v2258_v10, 4 }
 0x19c   :  { %2259 = vpow2.f32 %v1643_v17  ;;  %v1541_v38 = vpop.f32.mrf.mxu0  ;;  %v1570_v53 = vpop.f32.mrf.mxu1 }
 0x19d   :  { %v1659_v5 = vadd.f32 %v2258_v10, %v1658_v35  ;;  %v1597_v20 = vpop.f32.mrf.mxu2  ;;  %v1542_v48 = vadd.f32 %v1541_v38, %v1513_v6 }
 0x19e   :  { %v1598_v25 = vadd.f32 %v1597_v20, %v1569_v37  ;;  %v1626_v34 = vpop.f32.mrf.mxu3  ;;  %v1521_v37 = vadd.f32 %v2783_v43, %v1492_v24 }
 0x19f   :  { %v1660_v32 = vrot.slane %v1659_v5, 2  ;;  %v1571_v59 = vadd.f32 %v1570_v53, %v1542_v48  ;;  %v1465_v53 = vadd.f32 %v2779_v54, %v2777_v27 }
 0x1a0   :  { %v1627_v50 = vadd.f32 %v1626_v34, %v1598_v25 }
 0x1a1   :  { %v1661_v61 = vadd.f32 %v1660_v32, %v1659_v5  ;;  %v1494_v48 = vadd.f32 %v2785_v45, %v1465_v53 }
 0x1a2   :  { %v2260_v12 = vpop.eup %2259  ;;  %v1645_v31 = vmul.f32 1.442695, %v1627_v50 }
 0x1a3   :  { %v1664_v58 = vrot.slane %v2260_v12, 4  ;;  %v1662_v11 = vrot.slane %v1661_v61, 1 }
 0x1a4   :  { %2261 = vpow2.f32 %v1645_v31  ;;  %v1544_v56 = vpop.f32.mrf.mxu0  ;;  %v1573_v55 = vpop.f32.mrf.mxu1 }
 0x1a5   :  { %v1665_v0 = vadd.f32 %v2260_v12, %v1664_v58  ;;  %v1599_v1 = vpop.f32.mrf.mxu2  ;;  %v1545_v7 = vadd.f32 %v1544_v56, %v1516_v14  ;;  %v1663_v33 = vadd.f32 %v1662_v11, %v1661_v61  ;;  %v1523_v61 = vadd.f32 %v2787_v60, %v1494_v48 }
 0x1a6   :  { %v1600_v3 = vadd.f32 %v1599_v1, %v1571_v59  ;;  %v1628_v4 = vpop.f32.mrf.mxu3 }
 0x1a7   :  { %v1666_v8 = vrot.slane %v1665_v0, 2  ;;  %v1574_v44 = vadd.f32 %v1573_v55, %v1545_v7 }
 0x1a8   :  { %v1629_v9 = vadd.f32 %v1628_v4, %v1600_v3 }
 0x1a9   :  { %v1667_v30 = vadd.f32 %v1666_v8, %v1665_v0 }
 0x1aa   :  { %v2262_v6 = vpop.eup %2261  ;;  %v1647_v13 = vmul.f32 1.442695, %v1629_v9 }
 0x1ab   :  { %v1668_v22 = vrot.slane %v1667_v30, 1  ;;  %v1670_v23 = vrot.slane %v2262_v6, 4 }
 0x1ac   :  { %2263 = vpow2.f32 %v1647_v13  ;;  %v1546_v46 = vpop.f32.mrf.mxu0  ;;  %v1575_v14 = vpop.f32.mrf.mxu1 }
 0x1ad   :  { %v1669_v36 = vadd.f32 %v1668_v22, %v1667_v30  ;;  %v1671_v26 = vadd.f32 %v2262_v6, %v1670_v23  ;;  %v1602_v52 = vpop.f32.mrf.mxu2  ;;  %v1547_v18 = vadd.f32 %v1546_v46, %v2775_v28 }
 0x1ae   :  { %v1603_v39 = vadd.f32 %v1602_v52, %v1574_v44  ;;  %v1631_v40 = vpop.f32.mrf.mxu3 }
 0x1af   :  { %v1714_v21 = vsel %vm540_vm4, %v1669_v36, %v1663_v33  ;;  %v1672_v42 = vrot.slane %v1671_v26, 2  ;;  %v1576_v63 = vadd.f32 %v1575_v14, %v1547_v18 }
 0x1b0   :  { %v1632_v19 = vadd.f32 %v1631_v40, %v1603_v39 }
 0x1b1   :  { %v1673_v47 = vadd.f32 %v1672_v42, %v1671_v26 }
 0x1b2   :  { %v2264_v49 = vpop.eup %2263  ;;  %v1649_v41 = vmul.f32 1.442695, %v1632_v19 }
 0x1b3   :  { %v1674_v57 = vrot.slane %v1673_v47, 1  ;;  %v1676_v62 = vrot.slane %v2264_v49, 4 }
 0x1b4   :  { %2265 = vpow2.f32 %v1649_v41  ;;  %v1549_v2 = vpop.f32.mrf.mxu0  ;;  %v1578_v25 = vpop.f32.mrf.mxu1 }
 0x1b5   :  { %v1675_v10 = vadd.f32 %v1674_v57, %v1673_v47  ;;  %v1677_v17 = vadd.f32 %v2264_v49, %v1676_v62  ;;  %v1604_v35 = vpop.f32.mrf.mxu2  ;;  %v1550_v29 = vadd.f32 %v1549_v2, %v1521_v37 }
 0x1b6   :  { %v1605_v38 = vadd.f32 %v1604_v35, %v1576_v63  ;;  %v1633_v15 = vpop.f32.mrf.mxu3 }
 0x1b7   :  { %v1715_v16 = vsel %vm528_vm1, %v1675_v10, %v1714_v21  ;;  %v1678_v28 = vrot.slane %v1677_v17, 2  ;;  %v1579_v31 = vadd.f32 %v1578_v25, %v1550_v29  ;;  %vm1720_vm1 = vcmask 1047559  }
 0x1b8   :  { %v1634_v5 = vadd.f32 %v1633_v15, %v1605_v38 }
 0x1b9   :  { %v1679_v20 = vadd.f32 %v1678_v28, %v1677_v17 }
 0x1ba   :  { %v2266_v34 = vpop.eup %2265  ;;  %v1651_v50 = vmul.f32 1.442695, %v1634_v5 }
 0x1bb   :  { %v1680_v32 = vrot.slane %v1679_v20, 1  ;;  %v1682_v12 = vrot.slane %v2266_v34, 4 }
 0x1bc   :  { %2267 = vpow2.f32 %v1651_v50  ;;  %v1551_v59 = vpop.f32.mrf.mxu0  ;;  %v1580_v11 = vpop.f32.mrf.mxu1 }
 0x1bd   :  { %v1681_v43 = vadd.f32 %v1680_v32, %v1679_v20  ;;  %v1683_v58 = vadd.f32 %v2266_v34, %v1682_v12  ;;  %v1607_v56 = vpop.f32.mrf.mxu2  ;;  %v1552_v1 = vadd.f32 %v1551_v59, %v1523_v61 }
 0x1be   :  { %v1608_v0 = vadd.f32 %v1607_v56, %v1579_v31  ;;  %v1636_v27 = vpop.f32.mrf.mxu3 }
 0x1bf   :  { %v1716_v54 = vsel %vm542_vm5, %v1681_v43, %v1715_v16  ;;  %v1684_v55 = vrot.slane %v1683_v58, 2  ;;  %v1581_v30 = vadd.f32 %v1580_v11, %v1552_v1 }
 0x1c0   :  { %v1637_v3 = vadd.f32 %v1636_v27, %v1608_v0 }
 0x1c1   :  { %v1685_v4 = vadd.f32 %v1684_v55, %v1683_v58 }
 0x1c2   :  { %v2268_v45 = vpop.eup %2267  ;;  %v1653_v8 = vmul.f32 1.442695, %v1637_v3 }
 0x1c3   :  { %v1686_v7 = vrot.slane %v1685_v4, 1  ;;  %v1688_v9 = vrot.slane %v2268_v45, 4 }
 0x1c4   :  { %2269 = vpow2.f32 %v1653_v8 }
 0x1c5   :  { %v1687_v6 = vadd.f32 %v1686_v7, %v1685_v4  ;;  %v1689_v13 = vadd.f32 %v2268_v45, %v1688_v9  ;;  %v1609_v22 = vpop.f32.mrf.mxu2 }
 0x1c6   :  { %v1610_v23 = vadd.f32 %v1609_v22, %v1581_v30  ;;  %v1638_v46 = vpop.f32.mrf.mxu3 }
 0x1c7   :  { %v1717_v60 = vsel %vm532_vm2, %v1687_v6, %v1716_v54  ;;  %v1690_v44 = vrot.slane %v1689_v13, 2 }
 0x1c8   :  { %v1639_v33 = vadd.f32 %v1638_v46, %v1610_v23 }
 0x1c9   :  { %v1691_v36 = vadd.f32 %v1690_v44, %v1689_v13 }
 0x1ca   :  { %v2270_v26 = vpop.eup %2269  ;;  %v1655_v52 = vmul.f32 1.442695, %v1639_v33 }
 0x1cb   :  { %v1692_v39 = vrot.slane %v1691_v36, 1  ;;  %v1694_v40 = vrot.slane %v2270_v26, 4 }
 0x1cc   :  { %2271 = vpow2.f32 %v1655_v52 }
 0x1cd   :  { %v1693_v21 = vadd.f32 %v1692_v39, %v1691_v36  ;;  %v1695_v42 = vadd.f32 %v2270_v26, %v1694_v40 }
 0x1cf   :  { %v1718_v14 = vsel %vm546_vm6, %v1693_v21, %v1717_v60  ;;  %v1696_v51 = vrot.slane %v1695_v42, 2 }
 0x1d1   :  { %v1697_v18 = vadd.f32 %v1696_v51, %v1695_v42 }
 0x1d2   :  { %v2272_v19 = vpop.eup %2271 }
 0x1d3   :  { %v1698_v47 = vrot.slane %v1697_v18, 1  ;;  %v1700_v49 = vrot.slane %v2272_v19, 4 }
 0x1d5   :  { %v1699_v24 = vadd.f32 %v1698_v47, %v1697_v18  ;;  %v1701_v41 = vadd.f32 %v2272_v19, %v1700_v49 }
 0x1d7   :  { %v1702_v57 = vrot.slane %v1701_v41, 2  ;;  %v1719_v62 = vsel %vm534_vm3, %v1699_v24, %v1718_v14 }
 0x1d9   :  { %v1703_v63 = vadd.f32 %v1702_v57, %v1701_v41 }
 0x1db   :  { %v1704_v2 = vrot.slane %v1703_v63, 1 }
 0x1dd   :  { %v1705_v10 = vadd.f32 %v1704_v2, %v1703_v63 }
 0x1df   :  { %v1721_v17 = vsel %vm1720_vm1, %v1705_v10, %v1719_v62 }
 0x1e0   :  { %v2150_v35 = vadd.f32 -1.0, %v1721_v17 }
 0x1e2   :  { %1730 = vst [vmem:[#allocation11] sm:$0xff] %v2150_v35 }
 0x1e3   :  { %1741 = dma.vmem_to_hbm [thread:$0]  %s1737_s3, 128, %s1739_s13, [#allocation5]  }
 0x1e4   :  { %2399 = dma.done.wait [#allocation5], 128  }
 0x1e5   :  { %2400 = vsyncadd [#allocation5], 4294967168 }
 0x1e6   :  { %1746 = vsyncpa [#allocation4], 1 }
 0x1e7   :  { %1747 = vsyncpa [#allocation7], 1 }
 0x1e8   :  { %1748 = vsyncpa [#allocation10], 1 }
 0x1e9   :  { %1749 = vsyncpa [#allocation5], 1 }

</bundles_post_ra>
